<compile_context>
chip_gen: v7x
topology: tpu7x:2x2x1
jax: 0.10.0
libtpu: 0.0.40
codegen_flags: <defaults>
</compile_context>

<pallas_src>
import functools

import jax
import jax.numpy as jnp
from jax import lax
from jax.experimental import pallas as pl
from jax.experimental.pallas import tpu as pltpu


# ----------------------------- roll-semantics probe -----------------------------

@functools.lru_cache(maxsize=None)
def _roll_mode(rows: int, lanes: int, shift: int) -> int:
    """Determine pltpu.roll lane-rotation semantics on this backend.

    Returns +1 if pltpu.roll(x, k, 1) == jnp.roll(x, k, 1),
            -1 if it is the opposite direction,
             0 if it is unusable here (kernel falls back to slice+concat).
    """
    x = jnp.broadcast_to(jnp.arange(lanes, dtype=jnp.float32), (rows, lanes))

    def probe_kernel(x_ref, o_ref):
        o_ref[...] = pltpu.roll(x_ref[...], shift, 1)

    try:
        out = jax.block_until_ready(
            pl.pallas_call(
                probe_kernel,
                out_shape=jax.ShapeDtypeStruct((rows, lanes), jnp.float32),
            )(x))
    except Exception:  # rotate not lowerable for this config -> safe fallback
        return 0
    if bool(jnp.all(out == jnp.roll(x, shift, axis=1))):
        return 1
    if bool(jnp.all(out == jnp.roll(x, -shift, axis=1))):
        return -1
    return 0


# ----------------------------- fused Pallas kernel -----------------------------

def fused_basic_block_kernel(x_ref, masks_ref, w1_ref, b1_ref, w2_ref, b2_ref,
                             sew1_ref, seb1_ref, sew2t_ref, seb2_ref,
                             out_ref, *, H, W, n_img, roll_mode):
    """Whole BasicBlock for `n_img` images concatenated along the lane axis.

    x_ref    : (C, n_img*H*W) f32   channel-major, lane-dense input block
    masks_ref: (8, n_img*H*W) f32   border-validity masks for the 8 non-center taps
    w1_ref   : (C, 9*C) bf16        conv1 im2col weights with BN1 scale folded in
    b1_ref   : (C, 1)   f32         folded BN1 bias
    w2_ref   : (C, 9*C) bf16        conv2 im2col weights with BN2 scale folded in
    b2_ref   : (C, 1)   f32         folded BN2 bias
    sew1_ref : (C, Ch)  f32         SE fc1 weight       seb1_ref: (1, Ch) SE fc1 bias
    sew2t_ref: (C, Ch)  f32         SE fc2 weight (T)   seb2_ref: (C, 1)  SE fc2 bias
    out_ref  : (C, n_img*H*W) f32
    """
    HW = H * W
    L = n_img * HW

    x = x_ref[...]                      # (C, L) f32, stays resident for the residual
    masks = masks_ref[...]              # (8, L) f32

    offsets = [(dy, dx) for dy in (-1, 0, 1) for dx in (-1, 0, 1)]

    def lane_roll(src, s):
        # result[:, p] = src[:, (p + s) mod L]; out-of-image reads are masked by caller.
        if roll_mode == 1:              # pltpu.roll == jnp.roll semantics
            return pltpu.roll(src, (-s) % L, 1)
        if roll_mode == -1:             # opposite rotation direction
            return pltpu.roll(src, s % L, 1)
        k = s % L                       # fallback: slice + concat
        return jnp.concatenate([src[:, k:], src[:, :k]], axis=1)

    def im2col(src):
        # (9*C, L) bf16 patch matrix; tap t = (dy+1)*3 + (dx+1) occupies rows
        # [t*C, (t+1)*C).  Cross-image / out-of-image lanes are exactly the lanes the
        # border masks zero out, so lane-axis image concatenation is safe.
        taps = []
        mi = 0
        for dy, dx in offsets:
            if dy == 0 and dx == 0:
                taps.append(src.astype(jnp.bfloat16))          # center tap: no mask
            else:
                t = lane_roll(src, dy * W + dx) * masks[mi:mi + 1]
                taps.append(t.astype(jnp.bfloat16))
                mi += 1
        return jnp.concatenate(taps, axis=0)

    # conv1 (single K = 9*C bf16 matmul, BN1 scale already folded) -> +bias -> ReLU
    a1 = jnp.dot(w1_ref[...], im2col(x), preferred_element_type=jnp.float32)
    a1 = jnp.maximum(a1 + b1_ref[...], 0.0)                    # (C, L) f32

    # conv2 -> +bias (BN2 scale folded)
    a2 = jnp.dot(w2_ref[...], im2col(a1), preferred_element_type=jnp.float32)
    a2 = a2 + b2_ref[...]                                      # (C, L) f32

    # SE + residual, per image (n_img is a small static count; slices are 256-lane
    # aligned so every store stays an unmasked lane-dense vst).
    sew1 = sew1_ref[...]
    seb1 = seb1_ref[...]
    sew2t = sew2t_ref[...]
    seb2 = seb2_ref[...]
    inv_hw = 1.0 / HW
    for b in range(n_img):
        sl = slice(b * HW, (b + 1) * HW)
        a2_b = a2[:, sl]
        # squeeze: global average pool over the spatial (lane) axis
        pooled = jnp.sum(a2_b, axis=1, keepdims=True) * inv_hw              # (C, 1)
        # excitation: tiny FCs as VPU mul + XLU reductions (off the MXU)
        h = jnp.maximum(
            jnp.sum(sew1 * pooled, axis=0, keepdims=True) + seb1, 0.0)      # (1, Ch)
        logits = jnp.sum(sew2t * h, axis=1, keepdims=True) + seb2           # (C, 1)
        gate = pl.reciprocal(1.0 + jnp.exp(-logits), approx=True)           # sigmoid
        out_ref[:, sl] = jnp.maximum(a2_b * gate + x[:, sl], 0.0).astype(out_ref.dtype)


# ----------------------------- wrappers -----------------------------

def conv_weight_to_im2col(w_oihw):
    """(Cout, Cin, 3, 3) PyTorch weight -> (Cout, 9*Cin) im2col weight (tap-major, Cin)."""
    cout, cin = w_oihw.shape[0], w_oihw.shape[1]
    return jnp.transpose(w_oihw, (0, 2, 3, 1)).reshape(cout, 9 * cin)


def fold_bn(gamma, beta, mean, var, eps=1e-5):
    scale = gamma / jnp.sqrt(var + eps)
    return scale, beta - mean * scale


def prepare_params(w1_oihw, bn1, w2_oihw, bn2, se_w1, se_b1, se_w2, se_b2,
                   eps=1e-5, conv_dtype=jnp.bfloat16):
    """Fold BN (inference) scales into the im2col conv weights; cast conv weights for MXU."""
    C = w1_oihw.shape[0]
    s1, b1 = fold_bn(*bn1, eps)
    s2, b2 = fold_bn(*bn2, eps)
    w1 = (s1[:, None] * conv_weight_to_im2col(w1_oihw)).astype(conv_dtype)
    w2 = (s2[:, None] * conv_weight_to_im2col(w2_oihw)).astype(conv_dtype)
    return {
        "w1": w1, "b1": b1.reshape(C, 1),
        "w2": w2, "b2": b2.reshape(C, 1),
        "se_w1": se_w1.astype(jnp.float32), "se_b1": se_b1.reshape(1, -1).astype(jnp.float32),
        "se_w2t": se_w2.T.astype(jnp.float32), "se_b2": se_b2.reshape(-1, 1).astype(jnp.float32),
    }


def basic_block_forward(x_nchw, params, images_per_step=None):
    """BasicBlock forward; input/output in PyTorch NCHW (stride=1, downsample=None)."""
    N, C, H, W = x_nchw.shape
    HW = H * W
    Ch = params["se_w1"].shape[-1]

    # Images per grid step: amortize per-step overhead, but keep >= 2 grid steps so the
    # ("parallel",) axis can be sharded across v7x's two TensorCores.
    nb = images_per_step if images_per_step is not None else max(1, N // 2)
    nb = max(1, min(nb, N))
    while N % nb:
        nb -= 1
    L = nb * HW
    grid_n = N // nb
    assert L % 128 == 0, "per-step lane width must be a multiple of 128"

    # Channel-major, lane-dense layout: image b occupies lanes [b*HW, (b+1)*HW).
    xcm = jnp.transpose(x_nchw.reshape(N, C, HW), (1, 0, 2)).reshape(C, N * HW)
    xcm = xcm.astype(jnp.float32)

    # 8 border-validity masks for the non-center taps (per-image via col % HW),
    # computed once and kept resident across the whole grid.
    q = jnp.arange(L, dtype=jnp.int32) % HW
    ys, xs = q // W, q % W
    offs = [(dy, dx) for dy in (-1, 0, 1) for dx in (-1, 0, 1) if (dy, dx) != (0, 0)]
    masks = jnp.stack(
        [((ys + dy >= 0) & (ys + dy < H) & (xs + dx >= 0) & (xs + dx < W))
         .astype(jnp.float32) for dy, dx in offs], axis=0)                  # (8, L)

    roll_mode = _roll_mode(C, L, W + 1)

    kernel = functools.partial(fused_basic_block_kernel,
                               H=H, W=W, n_img=nb, roll_mode=roll_mode)
    const = lambda n: (0, 0)            # resident small operands (never re-fetched)
    out = pl.pallas_call(
        kernel,
        out_shape=jax.ShapeDtypeStruct((C, N * HW), jnp.float32),
        grid_spec=pltpu.PrefetchScalarGridSpec(
            num_scalar_prefetch=0,
            grid=(grid_n,),
            in_specs=[
                pl.BlockSpec((C, L), lambda n: (0, n)),      # x block (nb images)
                pl.BlockSpec((8, L), const),                 # border masks
                pl.BlockSpec((C, 9 * C), const),             # w1 (bf16, BN folded)
                pl.BlockSpec((C, 1), const),                 # b1
                pl.BlockSpec((C, 9 * C), const),             # w2 (bf16, BN folded)
                pl.BlockSpec((C, 1), const),                 # b2
                pl.BlockSpec((C, Ch), const),                # SE fc1 weight
                pl.BlockSpec((1, Ch), const),                # SE fc1 bias
                pl.BlockSpec((C, Ch), const),                # SE fc2 weight (T)
                pl.BlockSpec((C, 1), const),                 # SE fc2 bias
            ],
            out_specs=pl.BlockSpec((C, L), lambda n: (0, n)),
        ),
        # NOTE: at real ResNet sizes (C >= 64, larger H*W) re-derive the per-step VMEM
        # budget for v7x's 64 MiB and set vmem_limit_bytes / shrink nb accordingly.
        compiler_params=pltpu.CompilerParams(dimension_semantics=("parallel",)),
    )(xcm, masks, params["w1"], params["b1"], params["w2"], params["b2"],
      params["se_w1"], params["se_b1"], params["se_w2t"], params["se_b2"])
    # TODO(synk): downsample / stride>1 branch not implemented (module default: stride=1, downsample=None).
    return jnp.transpose(out.reshape(C, N, HW), (1, 0, 2)).reshape(N, C, H, W)


# ----------------------------- pure-JAX reference -----------------------------

def basic_block_reference(x, rp):
    dn = ("NCHW", "OIHW", "NCHW")

    def conv_bn(inp, w, s, b, relu):
        y = lax.conv_general_dilated(inp, w, (1, 1), "SAME", dimension_numbers=dn)
        y = y * s.reshape(1, -1, 1, 1) + b.reshape(1, -1, 1, 1)
        return jnp.maximum(y, 0.0) if relu else y

    out = conv_bn(x, rp["w1"], rp["bn1_scale"], rp["bn1_bias"], True)
    out = conv_bn(out, rp["w2"], rp["bn2_scale"], rp["bn2_bias"], False)
    pooled = jnp.mean(out, axis=(2, 3))                                # (N, C)
    h = jnp.maximum(pooled @ rp["se_w1"] + rp["se_b1"], 0.0)
    s = jax.nn.sigmoid(h @ rp["se_w2"] + rp["se_b2"])                  # (N, C)
    out = jnp.maximum(out * s[:, :, None, None] + x, 0.0)
    return out


# ----------------------------- main -----------------------------

if __name__ == "__main__":
    # Small shapes: batch=4 (-> 2 images per grid step, 2 parallel steps),
    # inplanes=planes=16, spatial=16x16 (H*W=256 lane-dense), SE reduction r=4.
    N, C, H, W = 4, 16, 16, 16
    r = 4
    Ch = C // r
    eps = 1e-5

    keys = jax.random.split(jax.random.PRNGKey(0), 11)

    # Conv weights in PyTorch OIHW layout.
    w1_oihw = jax.random.normal(keys[0], (C, C, 3, 3), jnp.float32) * 0.1
    w2_oihw = jax.random.normal(keys[1], (C, C, 3, 3), jnp.float32) * 0.1

    # BatchNorm (inference) parameters.
    def make_bn(kg, kb):
        gamma = 1.0 + 0.1 * jax.random.normal(kg, (C,), jnp.float32)
        beta = 0.1 * jax.random.normal(kb, (C,), jnp.float32)
        mean = jnp.zeros((C,), jnp.float32)
        var = jnp.ones((C,), jnp.float32)
        return gamma, beta, mean, var

    bn1 = make_bn(keys[2], keys[3])
    bn2 = make_bn(keys[4], keys[5])

    # SE block: Linear(C, C//r) -> ReLU -> Linear(C//r, C) -> Sigmoid
    se_w1 = jax.random.normal(keys[6], (C, Ch), jnp.float32) * 0.2
    se_b1 = 0.05 * jax.random.normal(keys[7], (Ch,), jnp.float32)
    se_w2 = jax.random.normal(keys[8], (Ch, C), jnp.float32) * 0.2
    se_b2 = 0.05 * jax.random.normal(keys[9], (C,), jnp.float32)

    params = prepare_params(w1_oihw, bn1, w2_oihw, bn2, se_w1, se_b1, se_w2, se_b2, eps=eps)

    bn1_scale, bn1_bias = fold_bn(*bn1, eps)
    bn2_scale, bn2_bias = fold_bn(*bn2, eps)
    ref_params = {
        "w1": w1_oihw, "w2": w2_oihw,
        "bn1_scale": bn1_scale, "bn1_bias": bn1_bias,
        "bn2_scale": bn2_scale, "bn2_bias": bn2_bias,
        "se_w1": se_w1, "se_b1": se_b1, "se_w2": se_w2, "se_b2": se_b2,
    }

    x = jax.random.normal(keys[10], (N, C, H, W), jnp.float32)

    out = jax.block_until_ready(basic_block_forward(x, params))
    ref = jax.block_until_ready(basic_block_reference(x, ref_params))

    assert out.shape == (N, C, H, W), out.shape
    max_err = float(jnp.max(jnp.abs(out - ref)))
    # bf16 conv operands (f32 accumulation) vs. the f32 reference: tolerance relaxed
    # accordingly; structural errors would be O(1).
    assert max_err < 5e-2, f"mismatch vs reference: {max_err}"

    print("KERNEL_OK")
</pallas_src>

<mosaic_0001>
module attributes {stable_mosaic.version = 11 : i64} {
  func.func @probe_kernel(%arg0: memref<16x512xf32, #tpu.memory_space<vmem>>, %arg1: memref<16x512xf32, #tpu.memory_space<vmem>>) attributes {dimension_semantics = [], scalar_prefetch = 0 : i64, scratch_operands = 0 : i64, tpu.core_type = #tpu.core_type<tc>} {
    %c0 = arith.constant 0 : index
    %c0_0 = arith.constant 0 : index
    %0 = vector.load %arg0[%c0, %c0_0] : memref<16x512xf32, #tpu.memory_space<vmem>>, vector<16x512xf32>
    %c17_i32 = arith.constant 17 : i32
    %1 = tpu.dynamic_rotate %0 by %c17_i32 dim 1 : vector<16x512xf32>, i32 -> vector<16x512xf32>
    %c0_1 = arith.constant 0 : index
    %c0_2 = arith.constant 0 : index
    %2 = vector.load %arg1[%c0_1, %c0_2] : memref<16x512xf32, #tpu.memory_space<vmem>>, vector<16x512xf32>
    tpu.vector_store %arg1[%c0_1, %c0_2], %1 {strides = array<i32>} : memref<16x512xf32, #tpu.memory_space<vmem>>, vector<16x512xf32>,
    return
  }
}

module attributes {stable_mosaic.version = 11 : i64} {
  func.func @fused_basic_block_kernel(%arg0: i32, %arg1: memref<16x512xf32, #tpu.memory_space<vmem>>, %arg2: memref<8x512xf32, #tpu.memory_space<vmem>>, %arg3: memref<16x144xbf16, #tpu.memory_space<vmem>>, %arg4: memref<16x1xf32, #tpu.memory_space<vmem>>, %arg5: memref<16x144xbf16, #tpu.memory_space<vmem>>, %arg6: memref<16x1xf32, #tpu.memory_space<vmem>>, %arg7: memref<16x4xf32, #tpu.memory_space<vmem>>, %arg8: memref<1x4xf32, #tpu.memory_space<vmem>>, %arg9: memref<16x4xf32, #tpu.memory_space<vmem>>, %arg10: memref<16x1xf32, #tpu.memory_space<vmem>>, %arg11: memref<16x512xf32, #tpu.memory_space<vmem>>) attributes {dimension_semantics = [#tpu.dimension_semantics<parallel>], iteration_bounds = array<i64: 2>, scalar_prefetch = 0 : i64, scratch_operands = 0 : i64, tpu.core_type = #tpu.core_type<tc>, window_params = [{transform_indices = @transform_0, window_bounds = array<i64: 16, 512>}, {pipeline_mode = #tpu.pipeline_mode<synchronous>, transform_indices = @transform_1, window_bounds = array<i64: 8, 512>}, {pipeline_mode = #tpu.pipeline_mode<synchronous>, transform_indices = @transform_2, window_bounds = array<i64: 16, 144>}, {pipeline_mode = #tpu.pipeline_mode<synchronous>, transform_indices = @transform_3, window_bounds = array<i64: 16, 1>}, {pipeline_mode = #tpu.pipeline_mode<synchronous>, transform_indices = @transform_4, window_bounds = array<i64: 16, 144>}, {pipeline_mode = #tpu.pipeline_mode<synchronous>, transform_indices = @transform_5, window_bounds = array<i64: 16, 1>}, {pipeline_mode = #tpu.pipeline_mode<synchronous>, transform_indices = @transform_6, window_bounds = array<i64: 16, 4>}, {pipeline_mode = #tpu.pipeline_mode<synchronous>, transform_indices = @transform_7, window_bounds = array<i64: 1, 4>}, {pipeline_mode = #tpu.pipeline_mode<synchronous>, transform_indices = @transform_8, window_bounds = array<i64: 16, 4>}, {pipeline_mode = #tpu.pipeline_mode<synchronous>, transform_indices = @transform_9, window_bounds = array<i64: 16, 1>}, {transform_indices = @transform_10, window_bounds = array<i64: 16, 512>}]} {
    %c0 = arith.constant 0 : index
    %c0_0 = arith.constant 0 : index
    %0 = vector.load %arg1[%c0, %c0_0] : memref<16x512xf32, #tpu.memory_space<vmem>>, vector<16x512xf32>
    %c0_1 = arith.constant 0 : index
    %c0_2 = arith.constant 0 : index
    %1 = vector.load %arg2[%c0_1, %c0_2] : memref<8x512xf32, #tpu.memory_space<vmem>>, vector<8x512xf32>
    %c0_3 = arith.constant 0 : index
    %c0_4 = arith.constant 0 : index
    %2 = vector.load %arg3[%c0_3, %c0_4] : memref<16x144xbf16, #tpu.memory_space<vmem>>, vector<16x144xbf16>
    %3 = vector.extract_strided_slice %0 {offsets = [0, 495], sizes = [16, 17], strides = [1, 1]} : vector<16x512xf32> to vector<16x17xf32>
    %4 = vector.extract_strided_slice %0 {offsets = [0, 0], sizes = [16, 495], strides = [1, 1]} : vector<16x512xf32> to vector<16x495xf32>
    %5 = tpu.concatenate %3, %4 in 1 : vector<16x17xf32>, vector<16x495xf32> -> vector<16x512xf32>
    %6 = vector.extract_strided_slice %1 {offsets = [0, 0], sizes = [1, 512], strides = [1, 1]} : vector<8x512xf32> to vector<1x512xf32>
    %7 = vector.broadcast %6 : vector<1x512xf32> to vector<16x512xf32>
    %8 = arith.mulf %5, %7 : vector<16x512xf32>
    %9 = arith.truncf %8 : vector<16x512xf32> to vector<16x512xbf16>
    %10 = vector.extract_strided_slice %0 {offsets = [0, 496], sizes = [16, 16], strides = [1, 1]} : vector<16x512xf32> to vector<16x16xf32>
    %11 = vector.extract_strided_slice %0 {offsets = [0, 0], sizes = [16, 496], strides = [1, 1]} : vector<16x512xf32> to vector<16x496xf32>
    %12 = tpu.concatenate %10, %11 in 1 : vector<16x16xf32>, vector<16x496xf32> -> vector<16x512xf32>
    %13 = vector.extract_strided_slice %1 {offsets = [1, 0], sizes = [1, 512], strides = [1, 1]} : vector<8x512xf32> to vector<1x512xf32>
    %14 = vector.broadcast %13 : vector<1x512xf32> to vector<16x512xf32>
    %15 = arith.mulf %12, %14 : vector<16x512xf32>
    %16 = arith.truncf %15 : vector<16x512xf32> to vector<16x512xbf16>
    %17 = vector.extract_strided_slice %0 {offsets = [0, 497], sizes = [16, 15], strides = [1, 1]} : vector<16x512xf32> to vector<16x15xf32>
    %18 = vector.extract_strided_slice %0 {offsets = [0, 0], sizes = [16, 497], strides = [1, 1]} : vector<16x512xf32> to vector<16x497xf32>
    %19 = tpu.concatenate %17, %18 in 1 : vector<16x15xf32>, vector<16x497xf32> -> vector<16x512xf32>
    %20 = vector.extract_strided_slice %1 {offsets = [2, 0], sizes = [1, 512], strides = [1, 1]} : vector<8x512xf32> to vector<1x512xf32>
    %21 = vector.broadcast %20 : vector<1x512xf32> to vector<16x512xf32>
    %22 = arith.mulf %19, %21 : vector<16x512xf32>
    %23 = arith.truncf %22 : vector<16x512xf32> to vector<16x512xbf16>
    %24 = vector.extract_strided_slice %0 {offsets = [0, 511], sizes = [16, 1], strides = [1, 1]} : vector<16x512xf32> to vector<16x1xf32>
    %25 = vector.extract_strided_slice %0 {offsets = [0, 0], sizes = [16, 511], strides = [1, 1]} : vector<16x512xf32> to vector<16x511xf32>
    %26 = tpu.concatenate %24, %25 in 1 : vector<16x1xf32>, vector<16x511xf32> -> vector<16x512xf32>
    %27 = vector.extract_strided_slice %1 {offsets = [3, 0], sizes = [1, 512], strides = [1, 1]} : vector<8x512xf32> to vector<1x512xf32>
    %28 = vector.broadcast %27 : vector<1x512xf32> to vector<16x512xf32>
    %29 = arith.mulf %26, %28 : vector<16x512xf32>
    %30 = arith.truncf %29 : vector<16x512xf32> to vector<16x512xbf16>
    %31 = arith.truncf %0 : vector<16x512xf32> to vector<16x512xbf16>
    %32 = vector.extract_strided_slice %0 {offsets = [0, 1], sizes = [16, 511], strides = [1, 1]} : vector<16x512xf32> to vector<16x511xf32>
    %33 = vector.extract_strided_slice %0 {offsets = [0, 0], sizes = [16, 1], strides = [1, 1]} : vector<16x512xf32> to vector<16x1xf32>
    %34 = tpu.concatenate %32, %33 in 1 : vector<16x511xf32>, vector<16x1xf32> -> vector<16x512xf32>
    %35 = vector.extract_strided_slice %1 {offsets = [4, 0], sizes = [1, 512], strides = [1, 1]} : vector<8x512xf32> to vector<1x512xf32>
    %36 = vector.broadcast %35 : vector<1x512xf32> to vector<16x512xf32>
    %37 = arith.mulf %34, %36 : vector<16x512xf32>
    %38 = arith.truncf %37 : vector<16x512xf32> to vector<16x512xbf16>
    %39 = vector.extract_strided_slice %0 {offsets = [0, 15], sizes = [16, 497], strides = [1, 1]} : vector<16x512xf32> to vector<16x497xf32>
    %40 = vector.extract_strided_slice %0 {offsets = [0, 0], sizes = [16, 15], strides = [1, 1]} : vector<16x512xf32> to vector<16x15xf32>
    %41 = tpu.concatenate %39, %40 in 1 : vector<16x497xf32>, vector<16x15xf32> -> vector<16x512xf32>
    %42 = vector.extract_strided_slice %1 {offsets = [5, 0], sizes = [1, 512], strides = [1, 1]} : vector<8x512xf32> to vector<1x512xf32>
    %43 = vector.broadcast %42 : vector<1x512xf32> to vector<16x512xf32>
    %44 = arith.mulf %41, %43 : vector<16x512xf32>
    %45 = arith.truncf %44 : vector<16x512xf32> to vector<16x512xbf16>
    %46 = vector.extract_strided_slice %0 {offsets = [0, 16], sizes = [16, 496], strides = [1, 1]} : vector<16x512xf32> to vector<16x496xf32>
    %47 = vector.extract_strided_slice %0 {offsets = [0, 0], sizes = [16, 16], strides = [1, 1]} : vector<16x512xf32> to vector<16x16xf32>
    %48 = tpu.concatenate %46, %47 in 1 : vector<16x496xf32>, vector<16x16xf32> -> vector<16x512xf32>
    %49 = vector.extract_strided_slice %1 {offsets = [6, 0], sizes = [1, 512], strides = [1, 1]} : vector<8x512xf32> to vector<1x512xf32>
    %50 = vector.broadcast %49 : vector<1x512xf32> to vector<16x512xf32>
    %51 = arith.mulf %48, %50 : vector<16x512xf32>
    %52 = arith.truncf %51 : vector<16x512xf32> to vector<16x512xbf16>
    %53 = vector.extract_strided_slice %0 {offsets = [0, 17], sizes = [16, 495], strides = [1, 1]} : vector<16x512xf32> to vector<16x495xf32>
    %54 = vector.extract_strided_slice %0 {offsets = [0, 0], sizes = [16, 17], strides = [1, 1]} : vector<16x512xf32> to vector<16x17xf32>
    %55 = tpu.concatenate %53, %54 in 1 : vector<16x495xf32>, vector<16x17xf32> -> vector<16x512xf32>
    %56 = vector.extract_strided_slice %1 {offsets = [7, 0], sizes = [1, 512], strides = [1, 1]} : vector<8x512xf32> to vector<1x512xf32>
    %57 = vector.broadcast %56 : vector<1x512xf32> to vector<16x512xf32>
    %58 = arith.mulf %55, %57 : vector<16x512xf32>
    %59 = arith.truncf %58 : vector<16x512xf32> to vector<16x512xbf16>
    %60 = tpu.concatenate %9, %16, %23, %30, %31, %38, %45, %52, %59 in 0 : vector<16x512xbf16>, vector<16x512xbf16>, vector<16x512xbf16>, vector<16x512xbf16>, vector<16x512xbf16>, vector<16x512xbf16>, vector<16x512xbf16>, vector<16x512xbf16>, vector<16x512xbf16> -> vector<144x512xbf16>
    %cst = arith.constant dense<0.000000e+00> : vector<16x512xf32>
    %61 = tpu.matmul %2, %60, %cst {dimension_numbers = #tpu.dot_dimension_numbers<[1], [0], [0], [1], [0, 0, 1, 1], [], []>} : vector<16x144xbf16>, vector<144x512xbf16>, vector<16x512xf32> -> vector<16x512xf32>
    %c0_5 = arith.constant 0 : index
    %c0_6 = arith.constant 0 : index
    %62 = vector.load %arg4[%c0_5, %c0_6] : memref<16x1xf32, #tpu.memory_space<vmem>>, vector<16x1xf32>
    %63 = vector.broadcast %62 : vector<16x1xf32> to vector<16x512xf32>
    %64 = arith.addf %61, %63 : vector<16x512xf32>
    %cst_7 = arith.constant 0.000000e+00 : f32
    %65 = vector.broadcast %cst_7 : f32 to vector<16x512xf32>
    %66 = arith.maximumf %64, %65 : vector<16x512xf32>
    %c0_8 = arith.constant 0 : index
    %c0_9 = arith.constant 0 : index
    %67 = vector.load %arg5[%c0_8, %c0_9] : memref<16x144xbf16, #tpu.memory_space<vmem>>, vector<16x144xbf16>
    %68 = vector.extract_strided_slice %66 {offsets = [0, 495], sizes = [16, 17], strides = [1, 1]} : vector<16x512xf32> to vector<16x17xf32>
    %69 = vector.extract_strided_slice %66 {offsets = [0, 0], sizes = [16, 495], strides = [1, 1]} : vector<16x512xf32> to vector<16x495xf32>
    %70 = tpu.concatenate %68, %69 in 1 : vector<16x17xf32>, vector<16x495xf32> -> vector<16x512xf32>
    %71 = vector.extract_strided_slice %1 {offsets = [0, 0], sizes = [1, 512], strides = [1, 1]} : vector<8x512xf32> to vector<1x512xf32>
    %72 = vector.broadcast %71 : vector<1x512xf32> to vector<16x512xf32>
    %73 = arith.mulf %70, %72 : vector<16x512xf32>
    %74 = arith.truncf %73 : vector<16x512xf32> to vector<16x512xbf16>
    %75 = vector.extract_strided_slice %66 {offsets = [0, 496], sizes = [16, 16], strides = [1, 1]} : vector<16x512xf32> to vector<16x16xf32>
    %76 = vector.extract_strided_slice %66 {offsets = [0, 0], sizes = [16, 496], strides = [1, 1]} : vector<16x512xf32> to vector<16x496xf32>
    %77 = tpu.concatenate %75, %76 in 1 : vector<16x16xf32>, vector<16x496xf32> -> vector<16x512xf32>
    %78 = vector.extract_strided_slice %1 {offsets = [1, 0], sizes = [1, 512], strides = [1, 1]} : vector<8x512xf32> to vector<1x512xf32>
    %79 = vector.broadcast %78 : vector<1x512xf32> to vector<16x512xf32>
    %80 = arith.mulf %77, %79 : vector<16x512xf32>
    %81 = arith.truncf %80 : vector<16x512xf32> to vector<16x512xbf16>
    %82 = vector.extract_strided_slice %66 {offsets = [0, 497], sizes = [16, 15], strides = [1, 1]} : vector<16x512xf32> to vector<16x15xf32>
    %83 = vector.extract_strided_slice %66 {offsets = [0, 0], sizes = [16, 497], strides = [1, 1]} : vector<16x512xf32> to vector<16x497xf32>
    %84 = tpu.concatenate %82, %83 in 1 : vector<16x15xf32>, vector<16x497xf32> -> vector<16x512xf32>
    %85 = vector.extract_strided_slice %1 {offsets = [2, 0], sizes = [1, 512], strides = [1, 1]} : vector<8x512xf32> to vector<1x512xf32>
    %86 = vector.broadcast %85 : vector<1x512xf32> to vector<16x512xf32>
    %87 = arith.mulf %84, %86 : vector<16x512xf32>
    %88 = arith.truncf %87 : vector<16x512xf32> to vector<16x512xbf16>
    %89 = vector.extract_strided_slice %66 {offsets = [0, 511], sizes = [16, 1], strides = [1, 1]} : vector<16x512xf32> to vector<16x1xf32>
    %90 = vector.extract_strided_slice %66 {offsets = [0, 0], sizes = [16, 511], strides = [1, 1]} : vector<16x512xf32> to vector<16x511xf32>
    %91 = tpu.concatenate %89, %90 in 1 : vector<16x1xf32>, vector<16x511xf32> -> vector<16x512xf32>
    %92 = vector.extract_strided_slice %1 {offsets = [3, 0], sizes = [1, 512], strides = [1, 1]} : vector<8x512xf32> to vector<1x512xf32>
    %93 = vector.broadcast %92 : vector<1x512xf32> to vector<16x512xf32>
    %94 = arith.mulf %91, %93 : vector<16x512xf32>
    %95 = arith.truncf %94 : vector<16x512xf32> to vector<16x512xbf16>
    %96 = arith.truncf %66 : vector<16x512xf32> to vector<16x512xbf16>
    %97 = vector.extract_strided_slice %66 {offsets = [0, 1], sizes = [16, 511], strides = [1, 1]} : vector<16x512xf32> to vector<16x511xf32>
    %98 = vector.extract_strided_slice %66 {offsets = [0, 0], sizes = [16, 1], strides = [1, 1]} : vector<16x512xf32> to vector<16x1xf32>
    %99 = tpu.concatenate %97, %98 in 1 : vector<16x511xf32>, vector<16x1xf32> -> vector<16x512xf32>
    %100 = vector.extract_strided_slice %1 {offsets = [4, 0], sizes = [1, 512], strides = [1, 1]} : vector<8x512xf32> to vector<1x512xf32>
    %101 = vector.broadcast %100 : vector<1x512xf32> to vector<16x512xf32>
    %102 = arith.mulf %99, %101 : vector<16x512xf32>
    %103 = arith.truncf %102 : vector<16x512xf32> to vector<16x512xbf16>
    %104 = vector.extract_strided_slice %66 {offsets = [0, 15], sizes = [16, 497], strides = [1, 1]} : vector<16x512xf32> to vector<16x497xf32>
    %105 = vector.extract_strided_slice %66 {offsets = [0, 0], sizes = [16, 15], strides = [1, 1]} : vector<16x512xf32> to vector<16x15xf32>
    %106 = tpu.concatenate %104, %105 in 1 : vector<16x497xf32>, vector<16x15xf32> -> vector<16x512xf32>
    %107 = vector.extract_strided_slice %1 {offsets = [5, 0], sizes = [1, 512], strides = [1, 1]} : vector<8x512xf32> to vector<1x512xf32>
    %108 = vector.broadcast %107 : vector<1x512xf32> to vector<16x512xf32>
    %109 = arith.mulf %106, %108 : vector<16x512xf32>
    %110 = arith.truncf %109 : vector<16x512xf32> to vector<16x512xbf16>
    %111 = vector.extract_strided_slice %66 {offsets = [0, 16], sizes = [16, 496], strides = [1, 1]} : vector<16x512xf32> to vector<16x496xf32>
    %112 = vector.extract_strided_slice %66 {offsets = [0, 0], sizes = [16, 16], strides = [1, 1]} : vector<16x512xf32> to vector<16x16xf32>
    %113 = tpu.concatenate %111, %112 in 1 : vector<16x496xf32>, vector<16x16xf32> -> vector<16x512xf32>
    %114 = vector.extract_strided_slice %1 {offsets = [6, 0], sizes = [1, 512], strides = [1, 1]} : vector<8x512xf32> to vector<1x512xf32>
    %115 = vector.broadcast %114 : vector<1x512xf32> to vector<16x512xf32>
    %116 = arith.mulf %113, %115 : vector<16x512xf32>
    %117 = arith.truncf %116 : vector<16x512xf32> to vector<16x512xbf16>
    %118 = vector.extract_strided_slice %66 {offsets = [0, 17], sizes = [16, 495], strides = [1, 1]} : vector<16x512xf32> to vector<16x495xf32>
    %119 = vector.extract_strided_slice %66 {offsets = [0, 0], sizes = [16, 17], strides = [1, 1]} : vector<16x512xf32> to vector<16x17xf32>
    %120 = tpu.concatenate %118, %119 in 1 : vector<16x495xf32>, vector<16x17xf32> -> vector<16x512xf32>
    %121 = vector.extract_strided_slice %1 {offsets = [7, 0], sizes = [1, 512], strides = [1, 1]} : vector<8x512xf32> to vector<1x512xf32>
    %122 = vector.broadcast %121 : vector<1x512xf32> to vector<16x512xf32>
    %123 = arith.mulf %120, %122 : vector<16x512xf32>
    %124 = arith.truncf %123 : vector<16x512xf32> to vector<16x512xbf16>
    %125 = tpu.concatenate %74, %81, %88, %95, %96, %103, %110, %117, %124 in 0 : vector<16x512xbf16>, vector<16x512xbf16>, vector<16x512xbf16>, vector<16x512xbf16>, vector<16x512xbf16>, vector<16x512xbf16>, vector<16x512xbf16>, vector<16x512xbf16>, vector<16x512xbf16> -> vector<144x512xbf16>
    %cst_10 = arith.constant dense<0.000000e+00> : vector<16x512xf32>
    %126 = tpu.matmul %67, %125, %cst_10 {dimension_numbers = #tpu.dot_dimension_numbers<[1], [0], [0], [1], [0, 0, 1, 1], [], []>} : vector<16x144xbf16>, vector<144x512xbf16>, vector<16x512xf32> -> vector<16x512xf32>
    %c0_11 = arith.constant 0 : index
    %c0_12 = arith.constant 0 : index
    %127 = vector.load %arg6[%c0_11, %c0_12] : memref<16x1xf32, #tpu.memory_space<vmem>>, vector<16x1xf32>
    %128 = vector.broadcast %127 : vector<16x1xf32> to vector<16x512xf32>
    %129 = arith.addf %126, %128 : vector<16x512xf32>
    %c0_13 = arith.constant 0 : index
    %c0_14 = arith.constant 0 : index
    %130 = vector.load %arg7[%c0_13, %c0_14] : memref<16x4xf32, #tpu.memory_space<vmem>>, vector<16x4xf32>
    %c0_15 = arith.constant 0 : index
    %c0_16 = arith.constant 0 : index
    %131 = vector.load %arg8[%c0_15, %c0_16] : memref<1x4xf32, #tpu.memory_space<vmem>>, vector<1x4xf32>
    %c0_17 = arith.constant 0 : index
    %c0_18 = arith.constant 0 : index
    %132 = vector.load %arg9[%c0_17, %c0_18] : memref<16x4xf32, #tpu.memory_space<vmem>>, vector<16x4xf32>
    %c0_19 = arith.constant 0 : index
    %c0_20 = arith.constant 0 : index
    %133 = vector.load %arg10[%c0_19, %c0_20] : memref<16x1xf32, #tpu.memory_space<vmem>>, vector<16x1xf32>
    %134 = vector.extract_strided_slice %129 {offsets = [0, 0], sizes = [16, 256], strides = [1, 1]} : vector<16x512xf32> to vector<16x256xf32>
    %cst_21 = arith.constant dense<0.000000e+00> : vector<16xf32>
    %135 = vector.multi_reduction <add>, %134, %cst_21 [1] : vector<16x256xf32> to vector<16xf32>
    %136 = vector.shape_cast %135 : vector<16xf32> to vector<16x1xf32>
    %cst_22 = arith.constant 3.906250e-03 : f32
    %137 = vector.broadcast %cst_22 : f32 to vector<16x1xf32>
    %138 = arith.mulf %136, %137 : vector<16x1xf32>
    %139 = vector.broadcast %138 : vector<16x1xf32> to vector<16x4xf32>
    %140 = arith.mulf %130, %139 : vector<16x4xf32>
    %cst_23 = arith.constant dense<0.000000e+00> : vector<4xf32>
    %141 = vector.multi_reduction <add>, %140, %cst_23 [0] : vector<16x4xf32> to vector<4xf32>
    %142 = vector.shape_cast %141 : vector<4xf32> to vector<1x4xf32>
    %143 = arith.addf %142, %131 : vector<1x4xf32>
    %cst_24 = arith.constant 0.000000e+00 : f32
    %144 = vector.broadcast %cst_24 : f32 to vector<1x4xf32>
    %145 = arith.maximumf %143, %144 : vector<1x4xf32>
    %146 = vector.broadcast %145 : vector<1x4xf32> to vector<16x4xf32>
    %147 = arith.mulf %132, %146 : vector<16x4xf32>
    %cst_25 = arith.constant dense<0.000000e+00> : vector<16xf32>
    %148 = vector.multi_reduction <add>, %147, %cst_25 [1] : vector<16x4xf32> to vector<16xf32>
    %149 = vector.shape_cast %148 : vector<16xf32> to vector<16x1xf32>
    %150 = arith.addf %149, %133 : vector<16x1xf32>
    %cst_26 = arith.constant 0.000000e+00 : f32
    %151 = vector.broadcast %cst_26 : f32 to vector<16x1xf32>
    %152 = arith.subf %151, %150 : vector<16x1xf32>
    %153 = math.exp %152 : vector<16x1xf32>
    %cst_27 = arith.constant 1.000000e+00 : f32
    %154 = vector.broadcast %cst_27 : f32 to vector<16x1xf32>
    %155 = arith.addf %154, %153 : vector<16x1xf32>
    %156 = tpu.reciprocal %155 {approx = true} : vector<16x1xf32> -> vector<16x1xf32>
    %157 = vector.broadcast %156 : vector<16x1xf32> to vector<16x256xf32>
    %158 = arith.mulf %134, %157 : vector<16x256xf32>
    %159 = vector.extract_strided_slice %0 {offsets = [0, 0], sizes = [16, 256], strides = [1, 1]} : vector<16x512xf32> to vector<16x256xf32>
    %160 = arith.addf %158, %159 : vector<16x256xf32>
    %cst_28 = arith.constant 0.000000e+00 : f32
    %161 = vector.broadcast %cst_28 : f32 to vector<16x256xf32>
    %162 = arith.maximumf %160, %161 : vector<16x256xf32>
    %c0_29 = arith.constant 0 : index
    %c0_30 = arith.constant 0 : index
    %163 = vector.load %arg11[%c0_29, %c0_30] : memref<16x512xf32, #tpu.memory_space<vmem>>, vector<16x256xf32>
    tpu.vector_store %arg11[%c0_29, %c0_30], %162 {strides = array<i32>} : memref<16x512xf32, #tpu.memory_space<vmem>>, vector<16x256xf32>,
    %164 = vector.extract_strided_slice %129 {offsets = [0, 256], sizes = [16, 256], strides = [1, 1]} : vector<16x512xf32> to vector<16x256xf32>
    %cst_31 = arith.constant dense<0.000000e+00> : vector<16xf32>
    %165 = vector.multi_reduction <add>, %164, %cst_31 [1] : vector<16x256xf32> to vector<16xf32>
    %166 = vector.shape_cast %165 : vector<16xf32> to vector<16x1xf32>
    %cst_32 = arith.constant 3.906250e-03 : f32
    %167 = vector.broadcast %cst_32 : f32 to vector<16x1xf32>
    %168 = arith.mulf %166, %167 : vector<16x1xf32>
    %169 = vector.broadcast %168 : vector<16x1xf32> to vector<16x4xf32>
    %170 = arith.mulf %130, %169 : vector<16x4xf32>
    %cst_33 = arith.constant dense<0.000000e+00> : vector<4xf32>
    %171 = vector.multi_reduction <add>, %170, %cst_33 [0] : vector<16x4xf32> to vector<4xf32>
    %172 = vector.shape_cast %171 : vector<4xf32> to vector<1x4xf32>
    %173 = arith.addf %172, %131 : vector<1x4xf32>
    %cst_34 = arith.constant 0.000000e+00 : f32
    %174 = vector.broadcast %cst_34 : f32 to vector<1x4xf32>
    %175 = arith.maximumf %173, %174 : vector<1x4xf32>
    %176 = vector.broadcast %175 : vector<1x4xf32> to vector<16x4xf32>
    %177 = arith.mulf %132, %176 : vector<16x4xf32>
    %cst_35 = arith.constant dense<0.000000e+00> : vector<16xf32>
    %178 = vector.multi_reduction <add>, %177, %cst_35 [1] : vector<16x4xf32> to vector<16xf32>
    %179 = vector.shape_cast %178 : vector<16xf32> to vector<16x1xf32>
    %180 = arith.addf %179, %133 : vector<16x1xf32>
    %cst_36 = arith.constant 0.000000e+00 : f32
    %181 = vector.broadcast %cst_36 : f32 to vector<16x1xf32>
    %182 = arith.subf %181, %180 : vector<16x1xf32>
    %183 = math.exp %182 : vector<16x1xf32>
    %cst_37 = arith.constant 1.000000e+00 : f32
    %184 = vector.broadcast %cst_37 : f32 to vector<16x1xf32>
    %185 = arith.addf %184, %183 : vector<16x1xf32>
    %186 = tpu.reciprocal %185 {approx = true} : vector<16x1xf32> -> vector<16x1xf32>
    %187 = vector.broadcast %186 : vector<16x1xf32> to vector<16x256xf32>
    %188 = arith.mulf %164, %187 : vector<16x256xf32>
    %189 = vector.extract_strided_slice %0 {offsets = [0, 256], sizes = [16, 256], strides = [1, 1]} : vector<16x512xf32> to vector<16x256xf32>
    %190 = arith.addf %188, %189 : vector<16x256xf32>
    %cst_38 = arith.constant 0.000000e+00 : f32
    %191 = vector.broadcast %cst_38 : f32 to vector<16x256xf32>
    %192 = arith.maximumf %190, %191 : vector<16x256xf32>
    %c0_39 = arith.constant 0 : index
    %c256 = arith.constant 256 : index
    %193 = vector.load %arg11[%c0_39, %c256] : memref<16x512xf32, #tpu.memory_space<vmem>>, vector<16x256xf32>
    tpu.vector_store %arg11[%c0_39, %c256], %192 {strides = array<i32>} : memref<16x512xf32, #tpu.memory_space<vmem>>, vector<16x256xf32>,
    return
  }
  func.func @transform_0(%arg0: i32) -> (i32, i32) {
    %c0_i32 = arith.constant 0 : i32
    %c0_i32_0 = arith.constant 0 : i32
    return %c0_i32, %arg0 : i32, i32
  }
  func.func @transform_1(%arg0: i32) -> (i32, i32) {
    %c0_i32 = arith.constant 0 : i32
    %c0_i32_0 = arith.constant 0 : i32
    %c0_i32_1 = arith.constant 0 : i32
    return %c0_i32, %c0_i32_0 : i32, i32
  }
  func.func @transform_2(%arg0: i32) -> (i32, i32) {
    %c0_i32 = arith.constant 0 : i32
    %c0_i32_0 = arith.constant 0 : i32
    %c0_i32_1 = arith.constant 0 : i32
    return %c0_i32, %c0_i32_0 : i32, i32
  }
  func.func @transform_3(%arg0: i32) -> (i32, i32) {
    %c0_i32 = arith.constant 0 : i32
    %c0_i32_0 = arith.constant 0 : i32
    %c0_i32_1 = arith.constant 0 : i32
    return %c0_i32, %c0_i32_0 : i32, i32
  }
  func.func @transform_4(%arg0: i32) -> (i32, i32) {
    %c0_i32 = arith.constant 0 : i32
    %c0_i32_0 = arith.constant 0 : i32
    %c0_i32_1 = arith.constant 0 : i32
    return %c0_i32, %c0_i32_0 : i32, i32
  }
  func.func @transform_5(%arg0: i32) -> (i32, i32) {
    %c0_i32 = arith.constant 0 : i32
    %c0_i32_0 = arith.constant 0 : i32
    %c0_i32_1 = arith.constant 0 : i32
    return %c0_i32, %c0_i32_0 : i32, i32
  }
  func.func @transform_6(%arg0: i32) -> (i32, i32) {
    %c0_i32 = arith.constant 0 : i32
    %c0_i32_0 = arith.constant 0 : i32
    %c0_i32_1 = arith.constant 0 : i32
    return %c0_i32, %c0_i32_0 : i32, i32
  }
  func.func @transform_7(%arg0: i32) -> (i32, i32) {
    %c0_i32 = arith.constant 0 : i32
    %c0_i32_0 = arith.constant 0 : i32
    %c0_i32_1 = arith.constant 0 : i32
    return %c0_i32, %c0_i32_0 : i32, i32
  }
  func.func @transform_8(%arg0: i32) -> (i32, i32) {
    %c0_i32 = arith.constant 0 : i32
    %c0_i32_0 = arith.constant 0 : i32
    %c0_i32_1 = arith.constant 0 : i32
    return %c0_i32, %c0_i32_0 : i32, i32
  }
  func.func @transform_9(%arg0: i32) -> (i32, i32) {
    %c0_i32 = arith.constant 0 : i32
    %c0_i32_0 = arith.constant 0 : i32
    %c0_i32_1 = arith.constant 0 : i32
    return %c0_i32, %c0_i32_0 : i32, i32
  }
  func.func @transform_10(%arg0: i32) -> (i32, i32) {
    %c0_i32 = arith.constant 0 : i32
    %c0_i32_0 = arith.constant 0 : i32
    return %c0_i32, %arg0 : i32, i32
  }
}

</mosaic_0001>

<bundles_post_ra>
// kernel: tpu_custom_call.1
= control target key start
LH: loop header
LB: loop body
LE: loop exit
PB: predicated region body
PF: predicated region fallthrough
CT: control target
= control target key end

     0   :  { %6 = vsyncpa [#allocation3], 0  ;;  %s189_s0 = inlined_call_operand.hbm [shape: f32[16,512], index: 0, kind: input, shape index: {}]   ;;  %s190_s1 = inlined_call_operand.hbm [shape: f32[16,512], index: 1, kind: output, shape index: {}]  }
   0x1   :  { %7 = vsyncpa [#allocation4], 0  ;;  %s136_s6 = smov [#allocation2]   ;;  %s88_s10 = scalar_lea.hbm %s189_s0, 1024 }
   0x2   :  { %s13_s7 = sshll.u32 %s136_s6, 4  ;;  %p89_p0 = scmp.ne.s32.totalorder %s189_s0, %s88_s10  ;;  %s14_s7 = int_to_ptr.vmem [resolvable:$true] %s13_s7 }
   0x3   :  { %p92_p1 = scmp.lt.u32.totalorder %s88_s10, %s189_s0 }
   0x5   :  { %p94_p2 = pnand %p92_p1, %p89_p0 }
   0x7   :  { %97 = shalt.err (!%p94_p2)
}
   0x8   :  { %s98_s15 = scalar_lea.vmem %s14_s7, 1024  ;;  %p103_p4 = scmp.lt.s32.totalorder %s14_s7, %s14_s7 }
   0x9   :  { %p99_p3 = scmp.ne.s32.totalorder %s14_s7, %s98_s15  ;;  %p104_p5 = scmp.lt.s32.totalorder %s98_s15, %s98_s15 }
   0xb   :  { %p105_p6 = por %p104_p5, %p103_p4 }
   0xd   :  { %p106_p7 = pnand %p105_p6, %p99_p3 }
   0xf   :  { %109 = shalt.err (!%p106_p7)
}
  0x10   :  { %s137_s16 = smov 512   ;;  %s138_s17 = smov 32  }
  0x11   :  { %19 = dma.hbm_to_vmem [thread:$0]  %s189_s0, 1024, %s14_s7, [#allocation3], %s137_s16, %s137_s16, %s138_s17  }
  0x12   :  { %132 = dma.done.wait [#allocation3], 1024  }
  0x13   :  { %133 = vsyncadd [#allocation3], 4294966272  ;;  %v24_v0 = vld [vmem:[#allocation2 + $0x8] sm:$0xff]  ;;  %v23_v1 = vld [vmem:[#allocation2] sm:$0xff]  ;;  %s139_s20 = smov 17   ;;  %v47_v8 = vlaneseq  ;;  %s140_s0 = smov [#allocation5]  }
  0x14   :  { %35 = vrot.lane.b32.xlu1 %v24_v0, %s139_s20  ;;  %31 = vrot.lane.b32.xlu0 %v23_v1, %s139_s20  ;;  %v28_v2 = vld [vmem:[#allocation2 + $0x28] sm:$0xff]  ;;  %v27_v3 = vld [vmem:[#allocation2 + $0x20] sm:$0xff]  ;;  %v29_v4 = vld [vmem:[#allocation2 + $0x30] sm:$0xff]  ;;  %s71_s21 = sshll.u32 %s140_s0, 4  ;;  %s72_s21 = int_to_ptr.vmem [resolvable:$true] %s71_s21 }
  0x15   :  { %v25_v5 = vld [vmem:[#allocation2 + $0x10] sm:$0xff]  ;;  %v30_v6 = vld [vmem:[#allocation2 + $0x38] sm:$0xff]  ;;  %v48_v9 = vand.u32 127, %v47_v8  ;;  %s110_s22 = scalar_lea.vmem %s72_s21, 1024  ;;  %p115_p9 = scmp.lt.s32.totalorder %s72_s21, %s72_s21 }
  0x16   :  { %v26_v7 = vld [vmem:[#allocation2 + $0x18] sm:$0xff]  ;;  %p111_p8 = scmp.ne.s32.totalorder %s72_s21, %s110_s22  ;;  %p116_p10 = scmp.lt.s32.totalorder %s110_s22, %s110_s22 }
  0x17   :  { %vm49_vm0 = vcmp.lt.s32.totalorder %v48_v9, 17 }
  0x18   :  { %37 = vrot.lane.b32.xlu1 %v28_v2, %s139_s20  ;;  %33 = vrot.lane.b32.xlu0 %v27_v3, %s139_s20  ;;  %p117_p11 = por %p116_p10, %p115_p9 }
  0x1a   :  { %p118_p12 = pnand %p117_p11, %p111_p8 }
  0x1c   :  { %41 = vrot.lane.b32.xlu1 %v29_v4, %s139_s20  ;;  %39 = vrot.lane.b32.xlu0 %v25_v5, %s139_s20 }
  0x20   :  { %45 = vrot.lane.b32.xlu1 %v30_v6, %s139_s20  ;;  %43 = vrot.lane.b32.xlu0 %v26_v7, %s139_s20 }
  0x86   :  { %v36_v10 = vpop.permute.xlu1 %35  ;;  %v32_v11 = vpop.permute.xlu0 %31 }
  0x87   :  { %v54_v12 = vsel %vm49_vm0, %v32_v11, %v36_v10 }
  0x88   :  { %59 = vst [vmem:[#allocation5 + $0x8] sm:$0xff] %v54_v12 }
  0x8a   :  { %v38_v13 = vpop.permute.xlu1 %37  ;;  %v34_v14 = vpop.permute.xlu0 %33 }
  0x8b   :  { %v55_v15 = vsel %vm49_vm0, %v34_v14, %v38_v13 }
  0x8c   :  { %63 = vst [vmem:[#allocation5 + $0x28] sm:$0xff] %v55_v15 }
  0x8e   :  { %v42_v16 = vpop.permute.xlu1 %41  ;;  %v40_v17 = vpop.permute.xlu0 %39 }
  0x8f   :  { %v53_v18 = vsel %vm49_vm0, %v38_v13, %v42_v16  ;;  %v52_v19 = vsel %vm49_vm0, %v36_v10, %v40_v17 }
  0x90   :  { %64 = vst [vmem:[#allocation5 + $0x30] sm:$0xff] %v53_v18  ;;  %60 = vst [vmem:[#allocation5 + $0x10] sm:$0xff] %v52_v19 }
  0x92   :  { %v46_v20 = vpop.permute.xlu1 %45  ;;  %v44_v21 = vpop.permute.xlu0 %43 }
  0x93   :  { %v51_v22 = vsel %vm49_vm0, %v42_v16, %v46_v20  ;;  %v57_v23 = vsel %vm49_vm0, %v46_v20, %v34_v14  ;;  %v50_v24 = vsel %vm49_vm0, %v40_v17, %v44_v21  ;;  %v56_v25 = vsel %vm49_vm0, %v44_v21, %v32_v11 }
  0x94   :  { %62 = vst [vmem:[#allocation5 + $0x20] sm:$0xff] %v57_v23  ;;  %65 = vst [vmem:[#allocation5 + $0x38] sm:$0xff] %v51_v22 }
  0x95   :  { %58 = vst [vmem:[#allocation5] sm:$0xff] %v56_v25  ;;  %61 = vst [vmem:[#allocation5 + $0x18] sm:$0xff] %v50_v24 }
  0x96   :  { %121 = shalt.err (!%p118_p12)
}
  0x97   :  { %s122_s25 = scalar_lea.hbm %s190_s1, 1024 }
  0x98   :  { %p123_p13 = scmp.ne.s32.totalorder %s190_s1, %s122_s25  ;;  %p126_p0 = scmp.lt.u32.totalorder %s122_s25, %s190_s1 }
  0x9a   :  { %p128_p1 = pnand %p126_p0, %p123_p13 }
  0x9c   :  { %131 = shalt.err (!%p128_p1)
}
  0x9d   :  { %77 = dma.vmem_to_hbm [thread:$0]  %s72_s21, 1024, %s190_s1, [#allocation4], %s137_s16, %s137_s16, %s138_s17  }
  0x9e   :  { %134 = dma.done.wait [#allocation4], 1024  }
  0x9f   :  { %135 = vsyncadd [#allocation4], 4294966272 }
  0xa0   :  { %81 = vsyncpa [#allocation3], 1 }
  0xa1   :  { %82 = vsyncpa [#allocation4], 1 }

// kernel: tpu_custom_call.1
= control target key start
LH: loop header
LB: loop body
LE: loop exit
PB: predicated region body
PF: predicated region fallthrough
CT: control target
= control target key end

     0   :  { %15 = vsyncpa [#allocation3], 0  ;;  %s3160_s0 = inlined_call_operand.hbm [shape: f32[16,1024], index: 0, kind: input, shape index: {}]   ;;  %s3161_s1 = inlined_call_operand.vmem [shape: f32[8,512], index: 1, kind: input, shape index: {}]   ;;  %s3162_s2 = inlined_call_operand.vmem [shape: bf16[16,144], index: 2, kind: input, shape index: {}]   ;;  %s3163_s3 = inlined_call_operand.vmem [shape: f32[16,1], index: 3, kind: input, shape index: {}]   ;;  %s3164_s4 = inlined_call_operand.vmem [shape: bf16[16,144], index: 4, kind: input, shape index: {}]   ;;  %s3165_s5 = inlined_call_operand.vmem [shape: f32[16,1], index: 5, kind: input, shape index: {}]   ;;  %s3166_s6 = inlined_call_operand.vmem [shape: f32[16,4], index: 6, kind: input, shape index: {}]   ;;  %s3167_s7 = inlined_call_operand.vmem [shape: f32[1,4], index: 7, kind: input, shape index: {}]   ;;  %s3168_s8 = inlined_call_operand.vmem [shape: f32[16,4], index: 8, kind: input, shape index: {}]   ;;  %s3169_s9 = inlined_call_operand.vmem [shape: f32[16,1], index: 9, kind: input, shape index: {}]   ;;  %s3170_s10 = inlined_call_operand.hbm [shape: f32[16,1024], index: 10, kind: output, shape index: {}]  }
   0x1   :  { %17 = vsyncpa [#allocation3 + $0x1], 0 }
   0x2   :  { %18 = vsyncpa [#allocation4], 0 }
   0x3   :  { %20 = vsyncpa [#allocation4 + $0x1], 0  ;;  %s2045_s13 = smov 0   ;;  %s2047_s14 = smov 0  }
   0x4   :  { %s2049_s15 = smov 0   ;;  %s2051_s16 = smov 0  }
   0x5 LB: > { %s2066_s17 = sadd.s32 4294967295, %s1971_s16   ;;  %s1758_s18 = sadd.s32 4294967294, %s1971_s16   ;;  %s1971_s16 = sphi %s2051_s16, %s3313_s16   ;;  %s1967_s15 = sphi %s2049_s15, %s3312_s15   ;;  %s1963_s14 = sphi %s2047_s14, %s3311_s14   ;;  %s1959_s13 = sphi %s2045_s13, %s3310_s13  }
   0x6   : > { %s2070_s19 = sadd.s32 1, %s1971_s16   ;;  %s33_s20 = sadd.s32 1, %s1967_s15 }
   0x7   : > { %s30_s21 = ssub.s32 %s1971_s16, %s2070_s19  ;;  %p40_p0 = scmp.ne.s32.totalorder %s1967_s15, %s1963_s14 }
   0x8   : > { %p31_p1 = scmp.eq.s32.totalorder %s30_s21, 0  ;;  %p41_p2 = scmp.eq.s32.totalorder %s1971_s16, 0 }
   0x9   : > { %p46_p3 = scmp.ne.s32.totalorder %s1963_s14, %s1959_s13  ;;  %p47_p4 = scmp.eq.s32.totalorder %s2066_s17, 0 }
   0xa   : > { %s2082_s22 = scalar_select %p31_p1, %s1967_s15, %s33_s20  }
   0xb   : > { %p2084_p5 = por %p41_p2, %p40_p0  ;;  %p2088_p6 = por %p47_p4, %p46_p3 }
   0xc   : > { %3222 = sst [smem:[#allocation8_spill]] %s2082_s22  ;;  %p259_p7 = scmp.eq.s32.totalorder %s2066_s17, 1 }
   0xd   : > { %p265_p8 = scmp.eq.s32.totalorder %s1758_s18, 1  ;;  %p1794_p10 = scmp.lt.s32.totalorder %s1971_s16, 2 }
   0xe   : > { %p2095_p11 = por %p259_p7, %p40_p0  ;;  %s312_s27 = sand.u32 1, %s1967_s15  }
   0xf   : > { %p2099_p12 = por %p265_p8, %p46_p3  ;;  %s1780_s28 = sshll.u32 %s1971_s16, 9 }
  0x10   : > { %s3225_s25 = scalar_select %p2095_p11, 1, 0 }
  0x11   : > { %s3226_s26 = scalar_select %p2099_p12, 1, 0 }
  0x12   : > { %s1761_s29 = sshll.u32 %s312_s27, 6  ;;  %s2108_s12 = scalar_lea.hbm %s3160_s0, %s1780_s28 }
  0x13   : > { %s316_s18 = scalar_lea.vmem [#allocation2], %s1761_s29  ;;  %p2112_p13 = pnand %p1794_p10, %p2084_p5 }
  0x14   : > { %s323_s20 = sshll.u32 %s316_s18, 4  ;;  %s2119_s22 = scalar_lea.sflag [#allocation3], %s312_s27  ;;  %s2116_s20 = int_to_ptr.vmem [resolvable:$true] %s323_s20 }
  0x15   : > { %s1875_s28 = scalar_lea.hbm %s2108_s12, 1024  ;;  %p1877_p2 = pneg %p2112_p13 }
  0x16   : > { %p1876_p1 = scmp.ne.s32.totalorder %s2108_s12, %s1875_s28  ;;  %s1880_s30 = scalar_lea.hbm %s3160_s0, 2048 }
  0x17   : > { %p1881_p5 = scmp.lt.u32.totalorder %s2108_s12, %s3160_s0  ;;  %p1882_p7 = scmp.lt.u32.totalorder %s1880_s30, %s1875_s28 }
  0x18   : > { %p1878_p3 = pnand %p1877_p2, %p1876_p1  ;;  %p1884_p10 = scmp.lt.u32.totalorder %s1875_s28, %s2108_s12 }
  0x19   : > { %p1883_p8 = por %p1882_p7, %p1881_p5 }
  0x1a   : > { %p1879_p4 = pneg %p1878_p3 }
  0x1b   : > { %p1885_p9 = por %p1884_p10, %p1883_p8 }
  0x1d   : > { %p1886_p0 = pnand %p1885_p9, %p1879_p4 }
  0x1f   : > { %1889 = shalt.err (!%p1886_p0)
}
  0x20   : > { %s1890_s27 = scalar_lea.vmem %s2116_s20, 1024  ;;  %s1973_s23 = smov [#allocation2]  }
  0x21   : > { %p1891_p1 = scmp.ne.s32.totalorder %s2116_s20, %s1890_s27  ;;  %s1895_s29 = sshll.u32 %s1973_s23, 4  ;;  %s1896_s29 = int_to_ptr.vmem [resolvable:$false] %s1895_s29 }
  0x22   : > { %s1897_s11 = scalar_lea.vmem %s1896_s29, 2048  ;;  %p1898_p11 = scmp.lt.s32.totalorder %s2116_s20, %s1896_s29 }
  0x23   : > { %p1893_p3 = pnand %p1891_p1, %p1877_p2  ;;  %p1899_p5 = scmp.lt.s32.totalorder %s1897_s11, %s1890_s27 }
  0x25   : > { %p1894_p12 = pneg %p1893_p3  ;;  %p1900_p7 = por %p1899_p5, %p1898_p11 }
  0x27   : > { %p1901_p8 = pnand %p1900_p7, %p1894_p12 }
  0x29   : > { %1904 = shalt.err (!%p1901_p8)
}
  0x2a   : > { %s1974_s28 = smov 1024   ;;  %s1975_s30 = smov 512  }
  0x2b   : > { %s1976_s18 = smov 32   ;;  %p331_p9 = scmp.lt.s32.totalorder %s1971_s16, 3 }
  0x2c   : > { %1789 = dma.hbm_to_vmem [thread:$0]  (!%p2112_p13), %s2108_s12, 1024, %s2116_s20, %s2119_s22, %s1974_s28, %s1975_s30, %s1976_s18  }
  0x2d   : > { %p3228_p0 = scmp.ge.s32.totalorder %s1971_s16, 1 }
  0x2f   : > { %p332_p2 = pnand %p3228_p0, %p331_p9 }
  0x31   : > { %335 = sbr.rel (%p332_p2) target bundleno = 1491 (0x5d3), region = 60 }
  0x38   : > { %s2151_s27 = sand.u32 1, %s1963_s14  }
  0x39   : > { %s3172_s23 = sshll.u32 %s2151_s27, 6  ;;  %s338_s29 = scalar_lea.sflag [#allocation3], %s2151_s27 }
  0x3a   : > { %s2157_s11 = scalar_lea.vmem [#allocation2], %s3172_s23 }
  0x3b   : > { %1950 = dma.done.wait (%p2088_p6), %s338_s29, 1024  }
  0x3c   : > { %1952 = vsyncadd (%p2088_p6), %s338_s29, 4294966272  ;;  %v2164_v0 = vld [vmem:[%s2157_s11 + $0x18] sm:$0xff]  ;;  %v2167_v1 = vld [vmem:[%s2157_s11] sm:$0xff]  ;;  %s1977_s22 = smov 17   ;;  %s1978_s24 = smov 16   ;;  %v438_v8 = vlaneseq  ;;  %vm484_vm0 = vcmask 130048  }
  0x3d   : > { %397 = vrot.lane.b32.xlu0 %v2164_v0, %s1977_s22  ;;  %409 = vrot.lane.b32.xlu1 %v2167_v1, %s1977_s22  ;;  %v2174_v2 = vld [vmem:[%s2157_s11 + $0x38] sm:$0xff]  ;;  %v2177_v3 = vld [vmem:[%s2157_s11 + $0x8] sm:$0xff]  ;;  %s1979_s12 = smov 15   ;;  %s3179_s20 = smov 1   ;;  %v1985_v20 = vmov 0   ;;  %vm421_vm1 = vcmask 138240  }
  0x3e   : > { %v2184_v4 = vld [vmem:[%s2157_s11 + $0x10] sm:$0xff]  ;;  %v2187_v5 = vld [vmem:[%s2157_s11 + $0x20] sm:$0xff]  ;;  %v2194_v6 = vld [vmem:[%s2157_s11 + $0x28] sm:$0xff]  ;;  %s3177_s21 = smov 127   ;;  %s3175_s28 = smov 113   ;;  %v2307_v11 = vshrl.u32 %v438_v8, 7  ;;  %1843 = vset.pattern.permute.xlu0 %v1985_v20  ;;  %1844 = vset.pattern.permute.xlu1 %v1985_v20 }
  0x3f   : > { %v2197_v7 = vld [vmem:[%s2157_s11 + $0x30] sm:$0xff]  ;;  %s3173_s30 = smov 112   ;;  %s1984_s18 = smov 111   ;;  %v1847_v12 = vld [vmem:[%s3162_s2 + $0x4] ss:$8 sps:$4 sm:$0xff]   ;;  %v2320_v16 = vld [vmem:[%s3161_s1 + $0x18] sm:$0xff] }
  0x40   : > { %v2315_v15 = vld [vmem:[%s3161_s1 + $0x8] sm:$0xff]  ;;  %1769 = vmatprep.mubr.msk.bf16.mxu0 %vm484_vm0, %v1847_v12  ;;  %1770 = vmatprep.mubr.msk.bf16.mxu1 %vm484_vm0, %v1847_v12  ;;  %v2329_v17 = vsub.s32 0, %v2307_v11  ;;  %v2334_v18 = vld [vmem:[%s3161_s1 + $0x10] sm:$0xff]  ;;  %v2339_v19 = vld [vmem:[%s3161_s1] sm:$0xff]  ;;  %v503_v53 = vsub.s32 1, %v2307_v11  ;;  %vm547_vm2 = vcmask 121856  }
  0x41   : > { %399 = vrot.lane.b32.xlu0 %v2174_v2, %s1977_s22  ;;  %411 = vrot.lane.b32.xlu1 %v2177_v3, %s1977_s22  ;;  %v911_v31 = vld [vmem:[%s3163_s3] sm:$0xff]  ;;  %v912_v32 = vld [vmem:[%s3163_s3 + $0x8] sm:$0xff]  ;;  %vm610_vm3 = vcmask 7168   ;;  %vm675_vm4 = vcmask 1039360   ;;  %vm738_vm5 = vcmask 924672   ;;  %vm801_vm6 = vcmask 916480  }
  0x42   : > { %3229 = vst [vmem:[#allocation9_spill] sm:$0xff] %v2329_v17  ;;  %v2343_v23 = vrot.slane %v2315_v15, %v2329_v17  ;;  %v2347_v24 = vrot.slane %v2320_v16, %v2329_v17  ;;  %v2354_v28 = vrot.slane %v2334_v18, %v2329_v17  ;;  %v2363_v30 = vrot.slane %v2339_v19, %v2329_v17  ;;  %s3248_s29 = smov 127   ;;  %s3249_s23 = smov 113  }
  0x43   : > { %v2385_v56 = vrot.slane %v2315_v15, %v503_v53  ;;  %v2388_v57 = vrot.slane %v2334_v18, %v503_v53  ;;  %v2393_v62 = vrot.slane %v2320_v16, %v503_v53  ;;  %v2397_v8 = vrot.slane %v2339_v19, %v503_v53  ;;  %p3306_p11 = scmp.ne.s32.totalorder %s3225_s25, 0 }
  0x44   : > { %vm864_vm7 = vcmask 908288   ;;  %vm1538_vm8 = vcmask 31744  }
  0x45   : > { %413 = vrot.lane.b32.xlu0 %v2184_v4, %s1977_s22  ;;  %415 = vrot.lane.b32.xlu1 %v2187_v5, %s1977_s22 }
  0x49   : > { %417 = vrot.lane.b32.xlu0 %v2194_v6, %s1977_s22  ;;  %419 = vrot.lane.b32.xlu1 %v2197_v7, %s1977_s22 }
  0x4d   : > { %466 = vrot.lane.b32.xlu0 %v2164_v0, %s1978_s24  ;;  %468 = vrot.lane.b32.xlu1 %v2174_v2, %s1978_s24 }
  0x51   : > { %472 = vrot.lane.b32.xlu0 %v2167_v1, %s1978_s24  ;;  %474 = vrot.lane.b32.xlu1 %v2177_v3, %s1978_s24 }
  0x55   : > { %476 = vrot.lane.b32.xlu0 %v2184_v4, %s1978_s24  ;;  %478 = vrot.lane.b32.xlu1 %v2187_v5, %s1978_s24 }
  0x59   : > { %480 = vrot.lane.b32.xlu0 %v2194_v6, %s1978_s24  ;;  %482 = vrot.lane.b32.xlu1 %v2197_v7, %s1978_s24 }
  0x5d   : > { %529 = vrot.lane.b32.xlu0 %v2164_v0, %s1979_s12  ;;  %531 = vrot.lane.b32.xlu1 %v2174_v2, %s1979_s12 }
  0x61   : > { %535 = vrot.lane.b32.xlu0 %v2167_v1, %s1979_s12  ;;  %537 = vrot.lane.b32.xlu1 %v2177_v3, %s1979_s12 }
  0x65   : > { %539 = vrot.lane.b32.xlu0 %v2184_v4, %s1979_s12  ;;  %541 = vrot.lane.b32.xlu1 %v2187_v5, %s1979_s12 }
  0x69   : > { %543 = vrot.lane.b32.xlu0 %v2194_v6, %s1979_s12  ;;  %545 = vrot.lane.b32.xlu1 %v2197_v7, %s1979_s12 }
  0x6d   : > { %592 = vrot.lane.b32.xlu0 %v2164_v0, %s3179_s20  ;;  %594 = vrot.lane.b32.xlu1 %v2174_v2, %s3179_s20 }
  0x71   : > { %598 = vrot.lane.b32.xlu0 %v2167_v1, %s3179_s20  ;;  %600 = vrot.lane.b32.xlu1 %v2177_v3, %s3179_s20 }
  0x75   : > { %602 = vrot.lane.b32.xlu0 %v2184_v4, %s3179_s20  ;;  %604 = vrot.lane.b32.xlu1 %v2187_v5, %s3179_s20 }
  0x79   : > { %606 = vrot.lane.b32.xlu0 %v2194_v6, %s3179_s20  ;;  %608 = vrot.lane.b32.xlu1 %v2197_v7, %s3179_s20 }
  0x7d   : > { %659 = vrot.lane.b32.xlu0 %v2167_v1, %s3177_s21  ;;  %661 = vrot.lane.b32.xlu1 %v2177_v3, %s3177_s21 }
  0x81   : > { %663 = vrot.lane.b32.xlu0 %v2184_v4, %s3177_s21  ;;  %665 = vrot.lane.b32.xlu1 %v2164_v0, %s3177_s21 }
  0x85   : > { %667 = vrot.lane.b32.xlu0 %v2187_v5, %s3177_s21  ;;  %669 = vrot.lane.b32.xlu1 %v2194_v6, %s3177_s21 }
  0x89   : > { %671 = vrot.lane.b32.xlu0 %v2197_v7, %s3177_s21  ;;  %673 = vrot.lane.b32.xlu1 %v2174_v2, %s3177_s21 }
  0x8d   : > { %722 = vrot.lane.b32.xlu0 %v2167_v1, %s3175_s28  ;;  %724 = vrot.lane.b32.xlu1 %v2177_v3, %s3175_s28 }
  0x91   : > { %726 = vrot.lane.b32.xlu0 %v2184_v4, %s3175_s28  ;;  %728 = vrot.lane.b32.xlu1 %v2164_v0, %s3175_s28 }
  0x95   : > { %730 = vrot.lane.b32.xlu0 %v2187_v5, %s3175_s28  ;;  %732 = vrot.lane.b32.xlu1 %v2194_v6, %s3175_s28 }
  0x99   : > { %734 = vrot.lane.b32.xlu0 %v2197_v7, %s3175_s28  ;;  %736 = vrot.lane.b32.xlu1 %v2174_v2, %s3175_s28  ;;  %s3250_s28 = smov 112  }
  0x9d   : > { %785 = vrot.lane.b32.xlu0 %v2167_v1, %s3173_s30  ;;  %787 = vrot.lane.b32.xlu1 %v2177_v3, %s3173_s30 }
  0xa1   : > { %789 = vrot.lane.b32.xlu0 %v2184_v4, %s3173_s30  ;;  %791 = vrot.lane.b32.xlu1 %v2164_v0, %s3173_s30 }
  0xa5   : > { %793 = vrot.lane.b32.xlu0 %v2187_v5, %s3173_s30  ;;  %795 = vrot.lane.b32.xlu1 %v2194_v6, %s3173_s30 }
  0xa9   : > { %797 = vrot.lane.b32.xlu0 %v2197_v7, %s3173_s30  ;;  %799 = vrot.lane.b32.xlu1 %v2174_v2, %s3173_s30  ;;  %s3247_s30 = smov 1  }
  0xad   : > { %848 = vrot.lane.b32.xlu0 %v2167_v1, %s1984_s18  ;;  %850 = vrot.lane.b32.xlu1 %v2177_v3, %s1984_s18 }
  0xaf   : > { %v398_v9 = vpop.permute.xlu0 %397  ;;  %v410_v10 = vpop.permute.xlu1 %409 }
  0xb0   : > { %v436_v33 = vsel %vm421_vm1, %v398_v9, %v410_v10 }
  0xb1   : > { %852 = vrot.lane.b32.xlu0 %v2184_v4, %s1984_s18  ;;  %854 = vrot.lane.b32.xlu1 %v2164_v0, %s1984_s18  ;;  %v454_v46 = vmul.f32 %v2363_v30, %v436_v33 }
  0xb3   : > { %v400_v13 = vpop.permute.xlu0 %399  ;;  %v412_v14 = vpop.permute.xlu1 %411 }
  0xb4   : > { %v422_v26 = vsel %vm421_vm1, %v410_v10, %v412_v14 }
  0xb5   : > { %856 = vrot.lane.b32.xlu0 %v2187_v5, %s1984_s18  ;;  %858 = vrot.lane.b32.xlu1 %v2194_v6, %s1984_s18  ;;  %v455_v36 = vmul.f32 %v2343_v23, %v422_v26 }
  0xb7   : > { %v414_v21 = vpop.permute.xlu0 %413  ;;  %v416_v22 = vpop.permute.xlu1 %415 }
  0xb8   : > { %v437_v25 = vsel %vm421_vm1, %v400_v13, %v416_v22  ;;  %v424_v27 = vsel %vm421_vm1, %v414_v21, %v398_v9  ;;  %v423_v29 = vsel %vm421_vm1, %v412_v14, %v414_v21 }
  0xb9   : > { %860 = vrot.lane.b32.xlu0 %v2197_v7, %s1984_s18  ;;  %862 = vrot.lane.b32.xlu1 %v2174_v2, %s1984_s18  ;;  %v457_v37 = vmul.f32 %v2347_v24, %v424_v27  ;;  %v458_v38 = vmul.f32 %v2363_v30, %v437_v25  ;;  %v456_v42 = vmul.f32 %v2354_v28, %v423_v29 }
  0xbb   : > { %v418_v34 = vpop.permute.xlu0 %417  ;;  %v420_v35 = vpop.permute.xlu1 %419  ;;  %v462_v52 = vpack.c.bf16 %v458_v38, %v454_v46 }
  0xbc   : > { %v426_v39 = vsel %vm421_vm1, %v418_v34, %v420_v35  ;;  %v425_v40 = vsel %vm421_vm1, %v416_v22, %v418_v34  ;;  %v427_v41 = vsel %vm421_vm1, %v420_v35, %v400_v13 }
  0xbd   : > { %v459_v43 = vmul.f32 %v2343_v23, %v425_v40  ;;  %v461_v44 = vmul.f32 %v2347_v24, %v427_v41  ;;  %v460_v45 = vmul.f32 %v2354_v28, %v426_v39  ;;  %915 = vperm.xlu0 %1843, %v911_v31   ;;  %920 = vperm.xlu1 %1844, %v912_v32   ;;  %v566_v40 = vsub.s32 2, %v2307_v11 }
  0xbf   : > { %v467_v47 = vpop.permute.xlu0 %466  ;;  %v469_v48 = vpop.permute.xlu1 %468  ;;  %v463_v49 = vpack.c.bf16 %v459_v43, %v455_v36  ;;  %v465_v50 = vpack.c.bf16 %v461_v44, %v457_v37  ;;  %v464_v51 = vpack.c.bf16 %v460_v45, %v456_v42  ;;  %v2414_v43 = vrot.slane %v2315_v15, %v566_v40 }
  0xc0   : > { %v2417_v44 = vrot.slane %v2334_v18, %v566_v40 }
  0xc1   : > { %935 = vmatprep.subr.bf16.mxu0 %v463_v49  ;;  %978 = vmatprep.subr.bf16.mxu1 %v465_v50  ;;  %v2422_v49 = vrot.slane %v2320_v16, %v566_v40 }
  0xc2   : > { %936 = vmatpush1.bf16.msra.mxu0 %v462_v52  ;;  %979 = vmatpush1.bf16.msra.mxu1 %v464_v51  ;;  %v2426_v51 = vrot.slane %v2339_v19, %v566_v40 }
  0xc3   : > { %v473_v54 = vpop.permute.xlu0 %472  ;;  %v475_v55 = vpop.permute.xlu1 %474 }
  0xc4   : > { %v485_v60 = vsel %vm484_vm0, %v473_v54, %v475_v55  ;;  %v499_v10 = vsel %vm484_vm0, %v467_v47, %v473_v54 }
  0xc5   : > { %v518_v12 = vmul.f32 %v2385_v56, %v485_v60  ;;  %v517_v33 = vmul.f32 %v2397_v8, %v499_v10 }
  0xc7   : > { %v477_v58 = vpop.permute.xlu0 %476  ;;  %v479_v59 = vpop.permute.xlu1 %478 }
  0xc8   : > { %v486_v61 = vsel %vm484_vm0, %v475_v55, %v477_v58  ;;  %v500_v63 = vsel %vm484_vm0, %v469_v48, %v479_v59  ;;  %v487_v9 = vsel %vm484_vm0, %v477_v58, %v467_v47 }
  0xc9   : > { %v519_v13 = vmul.f32 %v2388_v57, %v486_v61  ;;  %v521_v21 = vmul.f32 %v2397_v8, %v500_v63  ;;  %v520_v27 = vmul.f32 %v2393_v62, %v487_v9 }
  0xcb   : > { %v481_v14 = vpop.permute.xlu0 %480  ;;  %v483_v20 = vpop.permute.xlu1 %482  ;;  %v525_v39 = vpack.c.bf16 %v521_v21, %v517_v33 }
  0xcc   : > { %v488_v22 = vsel %vm484_vm0, %v479_v59, %v481_v14  ;;  %v489_v25 = vsel %vm484_vm0, %v481_v14, %v483_v20  ;;  %v490_v26 = vsel %vm484_vm0, %v483_v20, %v469_v48 }
  0xcd   : > { %v522_v29 = vmul.f32 %v2385_v56, %v488_v22  ;;  %v523_v31 = vmul.f32 %v2388_v57, %v489_v25  ;;  %v524_v32 = vmul.f32 %v2393_v62, %v490_v26 }
  0xcf   : > { %v530_v34 = vpop.permute.xlu0 %529  ;;  %v532_v35 = vpop.permute.xlu1 %531  ;;  %v526_v36 = vpack.c.bf16 %v522_v29, %v518_v12  ;;  %v528_v37 = vpack.c.bf16 %v524_v32, %v520_v27  ;;  %v527_v38 = vpack.c.bf16 %v523_v31, %v519_v13  ;;  %v629_v31 = vsub.s32 3, %v2307_v11 }
  0xd1   : > { %937 = vmatprep.subr.bf16.mxu0 %v526_v36  ;;  %980 = vmatprep.subr.bf16.mxu1 %v528_v37  ;;  %v2451_v40 = vrot.slane %v2320_v16, %v629_v31 }
  0xd2   : > { %938 = vmatpush1.bf16.msra.mxu0 %v525_v39  ;;  %981 = vmatpush1.bf16.msra.mxu1 %v527_v38 }
  0xd3   : > { %v536_v41 = vpop.permute.xlu0 %535  ;;  %v538_v42 = vpop.permute.xlu1 %537 }
  0xd4   : > { %v548_v47 = vsel %vm547_vm2, %v536_v41, %v538_v42  ;;  %v562_v53 = vsel %vm547_vm2, %v530_v34, %v536_v41 }
  0xd5   : > { %v581_v54 = vmul.f32 %v2414_v43, %v548_v47  ;;  %v580_v20 = vmul.f32 %v2426_v51, %v562_v53 }
  0xd7   : > { %v540_v45 = vpop.permute.xlu0 %539  ;;  %v542_v46 = vpop.permute.xlu1 %541 }
  0xd8   : > { %v549_v48 = vsel %vm547_vm2, %v538_v42, %v540_v45  ;;  %v563_v50 = vsel %vm547_vm2, %v532_v35, %v542_v46  ;;  %v550_v52 = vsel %vm547_vm2, %v540_v45, %v530_v34  ;;  %v2443_v34 = vrot.slane %v2315_v15, %v629_v31 }
  0xd9   : > { %v582_v55 = vmul.f32 %v2417_v44, %v549_v48  ;;  %v584_v60 = vmul.f32 %v2426_v51, %v563_v50  ;;  %v583_v10 = vmul.f32 %v2422_v49, %v550_v52  ;;  %v2455_v42 = vrot.slane %v2339_v19, %v629_v31 }
  0xdb   : > { %v544_v58 = vpop.permute.xlu0 %543  ;;  %v546_v59 = vpop.permute.xlu1 %545  ;;  %v588_v29 = vpack.c.bf16 %v584_v60, %v580_v20 }
  0xdc   : > { %v551_v61 = vsel %vm547_vm2, %v542_v46, %v544_v58  ;;  %v552_v63 = vsel %vm547_vm2, %v544_v58, %v546_v59  ;;  %v553_v9 = vsel %vm547_vm2, %v546_v59, %v532_v35  ;;  %v2446_v35 = vrot.slane %v2334_v18, %v629_v31 }
  0xdd   : > { %v585_v12 = vmul.f32 %v2414_v43, %v551_v61  ;;  %v586_v13 = vmul.f32 %v2417_v44, %v552_v63  ;;  %v587_v14 = vmul.f32 %v2422_v49, %v553_v9 }
  0xdf   : > { %v593_v21 = vpop.permute.xlu0 %592  ;;  %v595_v22 = vpop.permute.xlu1 %594  ;;  %v589_v25 = vpack.c.bf16 %v585_v12, %v581_v54  ;;  %v591_v26 = vpack.c.bf16 %v587_v14, %v583_v10  ;;  %v590_v27 = vpack.c.bf16 %v586_v13, %v582_v55  ;;  %v656_v10 = vpack.c.bf16 %v2194_v6, %v2177_v3 }
  0xe1   : > { %939 = vmatprep.subr.bf16.mxu0 %v589_v25  ;;  %982 = vmatprep.subr.bf16.mxu1 %v591_v26  ;;  %v655_v26 = vpack.c.bf16 %v2187_v5, %v2167_v1 }
  0xe2   : > { %940 = vmatpush1.bf16.msra.mxu0 %v588_v29  ;;  %983 = vmatpush1.bf16.msra.mxu1 %v590_v27  ;;  %v657_v27 = vpack.c.bf16 %v2197_v7, %v2184_v4  ;;  %v696_v29 = vsub.s32 4, %v2307_v11 }
  0xe3   : > { %v599_v32 = vpop.permute.xlu0 %598  ;;  %v601_v33 = vpop.permute.xlu1 %600 }
  0xe4   : > { %v611_v38 = vsel %vm610_vm3, %v599_v32, %v601_v33  ;;  %v625_v46 = vsel %vm610_vm3, %v593_v21, %v599_v32  ;;  %v2488_v7 = vrot.slane %v2320_v16, %v696_v29 }
  0xe5   : > { %v644_v47 = vmul.f32 %v2443_v34, %v611_v38  ;;  %v643_v9 = vmul.f32 %v2455_v42, %v625_v46 }
  0xe6   : > { %3232 = vst [vmem:[#allocation12_spill] sm:$0xff] %v2488_v7 }
  0xe7   : > { %v603_v36 = vpop.permute.xlu0 %602  ;;  %v605_v37 = vpop.permute.xlu1 %604 }
  0xe8   : > { %v612_v39 = vsel %vm610_vm3, %v601_v33, %v603_v36  ;;  %v626_v41 = vsel %vm610_vm3, %v595_v22, %v605_v37  ;;  %v613_v45 = vsel %vm610_vm3, %v603_v36, %v593_v21  ;;  %v2492_v33 = vrot.slane %v2339_v19, %v696_v29 }
  0xe9   : > { %v645_v48 = vmul.f32 %v2446_v35, %v612_v39  ;;  %v647_v53 = vmul.f32 %v2455_v42, %v626_v41  ;;  %v646_v59 = vmul.f32 %v2451_v40, %v613_v45 }
  0xea   : > { %3233 = vst [vmem:[#allocation13_spill] sm:$0xff] %v2492_v33 }
  0xeb   : > { %v607_v50 = vpop.permute.xlu0 %606  ;;  %v609_v52 = vpop.permute.xlu1 %608  ;;  %v651_v25 = vpack.c.bf16 %v647_v53, %v643_v9 }
  0xec   : > { %v614_v54 = vsel %vm610_vm3, %v605_v37, %v607_v50  ;;  %v615_v55 = vsel %vm610_vm3, %v607_v50, %v609_v52  ;;  %v616_v58 = vsel %vm610_vm3, %v609_v52, %v595_v22  ;;  %v658_v22 = vpack.c.bf16 %v2174_v2, %v2164_v0 }
  0xed   : > { %v648_v60 = vmul.f32 %v2443_v34, %v614_v54  ;;  %v649_v61 = vmul.f32 %v2446_v35, %v615_v55  ;;  %v650_v63 = vmul.f32 %v2451_v40, %v616_v58  ;;  %v2480_v0 = vrot.slane %v2315_v15, %v696_v29 }
  0xee   : > { %v2483_v2 = vrot.slane %v2334_v18, %v696_v29 }
  0xef   : > { %v660_v12 = vpop.permute.xlu0 %659  ;;  %v662_v13 = vpop.permute.xlu1 %661  ;;  %v652_v14 = vpack.c.bf16 %v648_v60, %v644_v47  ;;  %v654_v20 = vpack.c.bf16 %v650_v63, %v646_v59  ;;  %v653_v21 = vpack.c.bf16 %v649_v61, %v645_v48  ;;  %3230 = vst [vmem:[#allocation10_spill] sm:$0xff] %v2480_v0 }
  0xf0   : > { %3231 = vst [vmem:[#allocation11_spill] sm:$0xff] %v2483_v2  ;;  %v676_v37 = vsel %vm675_vm4, %v660_v12, %v662_v13 }
  0xf1   : > { %941 = vmatprep.subr.bf16.mxu0 %v652_v14  ;;  %984 = vmatprep.subr.bf16.mxu1 %v654_v20  ;;  %v710_v58 = vmul.f32 %v2492_v33, %v676_v37  ;;  %v759_v14 = vsub.s32 5, %v2307_v11 }
  0xf2   : > { %942 = vmatpush1.bf16.msra.mxu0 %v651_v25  ;;  %985 = vmatpush1.bf16.msra.mxu1 %v653_v21 }
  0xf3   : > { %v664_v3 = vpop.permute.xlu0 %663  ;;  %v666_v6 = vpop.permute.xlu1 %665  ;;  %943 = vmatprep.subr.bf16.mxu0 %v656_v10  ;;  %986 = vmatprep.subr.bf16.mxu1 %v658_v22  ;;  %v2509_v20 = vrot.slane %v2315_v15, %v759_v14  ;;  %v2512_v21 = vrot.slane %v2334_v18, %v759_v14  ;;  %v2521_v29 = vrot.slane %v2339_v19, %v759_v14 }
  0xf4   : > { %v677_v5 = vsel %vm675_vm4, %v662_v13, %v664_v3  ;;  %v678_v4 = vsel %vm675_vm4, %v664_v3, %v666_v6  ;;  %v692_v36 = vsel %vm675_vm4, %v666_v6, %v660_v12  ;;  %v2517_v3 = vrot.slane %v2320_v16, %v759_v14 }
  0xf5   : > { %v711_v38 = vmul.f32 %v2480_v0, %v677_v5  ;;  %v712_v39 = vmul.f32 %v2483_v2, %v678_v4  ;;  %v713_v52 = vmul.f32 %v2488_v7, %v692_v36  ;;  %3234 = vst [vmem:[#allocation14_spill] sm:$0xff] %v2509_v20  ;;  %3235 = vst [vmem:[#allocation15_spill] sm:$0xff] %v2512_v21 }
  0xf6   : > { %944 = vmatpush1.bf16.msra.mxu0 %v655_v26  ;;  %987 = vmatpush1.bf16.msra.mxu1 %v657_v27  ;;  %3236 = vst [vmem:[#allocation16_spill] sm:$0xff] %v2517_v3  ;;  %3237 = vst [vmem:[#allocation17_spill] sm:$0xff] %v2521_v29 }
  0xf7   : > { %v668_v31 = vpop.permute.xlu0 %667  ;;  %v670_v1 = vpop.permute.xlu1 %669 }
  0xf8   : > { %v679_v32 = vsel %vm675_vm4, %v668_v31, %v670_v1 }
  0xf9   : > { %v714_v46 = vmul.f32 %v2492_v33, %v679_v32 }
  0xfb   : > { %v672_v41 = vpop.permute.xlu0 %671  ;;  %v674_v45 = vpop.permute.xlu1 %673  ;;  %v718_v10 = vpack.c.bf16 %v714_v46, %v710_v58 }
  0xfc   : > { %v680_v47 = vsel %vm675_vm4, %v670_v1, %v672_v41  ;;  %v681_v48 = vsel %vm675_vm4, %v672_v41, %v674_v45  ;;  %v693_v50 = vsel %vm675_vm4, %v674_v45, %v668_v31 }
  0xfd   : > { %v715_v53 = vmul.f32 %v2480_v0, %v680_v47  ;;  %v716_v54 = vmul.f32 %v2483_v2, %v681_v48  ;;  %v717_v55 = vmul.f32 %v2488_v7, %v693_v50 }
  0xff   : > { %v723_v59 = vpop.permute.xlu0 %722  ;;  %v725_v60 = vpop.permute.xlu1 %724  ;;  %v719_v61 = vpack.c.bf16 %v715_v53, %v711_v38  ;;  %v721_v63 = vpack.c.bf16 %v717_v55, %v713_v52  ;;  %v720_v9 = vpack.c.bf16 %v716_v54, %v712_v39 }
 0x100   : > { %v739_v1 = vsel %vm738_vm5, %v723_v59, %v725_v60 }
 0x101   : > { %945 = vmatprep.subr.bf16.mxu0 %v719_v61  ;;  %988 = vmatprep.subr.bf16.mxu1 %v721_v63  ;;  %v773_v50 = vmul.f32 %v2521_v29, %v739_v1  ;;  %v822_v63 = vsub.s32 6, %v2307_v11 }
 0x102   : > { %946 = vmatpush1.bf16.msra.mxu0 %v718_v10  ;;  %989 = vmatpush1.bf16.msra.mxu1 %v720_v9 }
 0x103   : > { %v727_v12 = vpop.permute.xlu0 %726  ;;  %v729_v13 = vpop.permute.xlu1 %728  ;;  %v2538_v9 = vrot.slane %v2315_v15, %v822_v63  ;;  %v2541_v10 = vrot.slane %v2334_v18, %v822_v63 }
 0x104   : > { %v740_v26 = vsel %vm738_vm5, %v725_v60, %v727_v12  ;;  %v741_v27 = vsel %vm738_vm5, %v727_v12, %v729_v13  ;;  %v755_v31 = vsel %vm738_vm5, %v729_v13, %v723_v59 }
 0x105   : > { %v774_v5 = vmul.f32 %v2509_v20, %v740_v26  ;;  %v775_v4 = vmul.f32 %v2512_v21, %v741_v27  ;;  %v776_v45 = vmul.f32 %v2517_v3, %v755_v31  ;;  %3238 = vst [vmem:[#allocation18_spill] sm:$0xff] %v2538_v9  ;;  %3239 = vst [vmem:[#allocation19_spill] sm:$0xff] %v2541_v10 }
 0x106   : > { %v2550_v27 = vrot.slane %v2339_v19, %v822_v63 }
 0x107   : > { %v731_v22 = vpop.permute.xlu0 %730  ;;  %v733_v25 = vpop.permute.xlu1 %732 }
 0x108   : > { %v742_v6 = vsel %vm738_vm5, %v731_v22, %v733_v25  ;;  %3241 = vst [vmem:[#allocation21_spill] sm:$0xff] %v2550_v27 }
 0x109   : > { %v777_v37 = vmul.f32 %v2521_v29, %v742_v6 }
 0x10b   : > { %v735_v32 = vpop.permute.xlu0 %734  ;;  %v737_v36 = vpop.permute.xlu1 %736  ;;  %v781_v59 = vpack.c.bf16 %v777_v37, %v773_v50 }
 0x10c   : > { %v743_v38 = vsel %vm738_vm5, %v733_v25, %v735_v32  ;;  %v744_v39 = vsel %vm738_vm5, %v735_v32, %v737_v36  ;;  %v756_v41 = vsel %vm738_vm5, %v737_v36, %v731_v22  ;;  %v2546_v25 = vrot.slane %v2320_v16, %v822_v63 }
 0x10d   : > { %v778_v46 = vmul.f32 %v2509_v20, %v743_v38  ;;  %v779_v47 = vmul.f32 %v2512_v21, %v744_v39  ;;  %v780_v48 = vmul.f32 %v2517_v3, %v756_v41 }
 0x10e   : > { %3240 = vst [vmem:[#allocation20_spill] sm:$0xff] %v2546_v25 }
 0x10f   : > { %v786_v52 = vpop.permute.xlu0 %785  ;;  %v788_v53 = vpop.permute.xlu1 %787  ;;  %v782_v54 = vpack.c.bf16 %v778_v46, %v774_v5  ;;  %v784_v55 = vpack.c.bf16 %v780_v48, %v776_v45  ;;  %v783_v58 = vpack.c.bf16 %v779_v47, %v775_v4 }
 0x110   : > { %v802_v31 = vsel %vm801_vm6, %v786_v52, %v788_v53 }
 0x111   : > { %947 = vmatprep.subr.bf16.mxu0 %v782_v54  ;;  %990 = vmatprep.subr.bf16.mxu1 %v784_v55  ;;  %v836_v48 = vmul.f32 %v2550_v27, %v802_v31 }
 0x112   : > { %948 = vmatpush1.bf16.msra.mxu0 %v781_v59  ;;  %991 = vmatpush1.bf16.msra.mxu1 %v783_v58 }
 0x113   : > { %v790_v60 = vpop.permute.xlu0 %789  ;;  %v792_v61 = vpop.permute.xlu1 %791 }
 0x114   : > { %v803_v14 = vsel %vm801_vm6, %v788_v53, %v790_v60  ;;  %v804_v22 = vsel %vm801_vm6, %v790_v60, %v792_v61  ;;  %v818_v6 = vsel %vm801_vm6, %v792_v61, %v786_v52  ;;  %v885_v61 = vsub.s32 7, %v2307_v11 }
 0x115   : > { %v837_v1 = vmul.f32 %v2538_v9, %v803_v14  ;;  %v838_v5 = vmul.f32 %v2541_v10, %v804_v22  ;;  %v839_v41 = vmul.f32 %v2546_v25, %v818_v6 }
 0x116   : > { %v2567_v63 = vrot.slane %v2315_v15, %v885_v61  ;;  %v2575_v6 = vrot.slane %v2320_v16, %v885_v61  ;;  %v2579_v11 = vrot.slane %v2339_v19, %v885_v61 }
 0x117   : > { %v794_v12 = vpop.permute.xlu0 %793  ;;  %v796_v13 = vpop.permute.xlu1 %795 }
 0x118   : > { %v805_v26 = vsel %vm801_vm6, %v794_v12, %v796_v13  ;;  %3242 = vst [vmem:[#allocation22_spill] sm:$0xff] %v2567_v63  ;;  %3244 = vst [vmem:[#allocation24_spill] sm:$0xff] %v2575_v6 }
 0x119   : > { %v840_v36 = vmul.f32 %v2550_v27, %v805_v26  ;;  %3245 = vst [vmem:[#allocation25_spill] sm:$0xff] %v2579_v11 }
 0x11b   : > { %v798_v4 = vpop.permute.xlu0 %797  ;;  %v800_v32 = vpop.permute.xlu1 %799  ;;  %v844_v58 = vpack.c.bf16 %v840_v36, %v836_v48 }
 0x11c   : > { %v806_v37 = vsel %vm801_vm6, %v796_v13, %v798_v4  ;;  %v807_v38 = vsel %vm801_vm6, %v798_v4, %v800_v32  ;;  %v819_v39 = vsel %vm801_vm6, %v800_v32, %v794_v12  ;;  %v2570_v12 = vrot.slane %v2334_v18, %v885_v61 }
 0x11d   : > { %v841_v45 = vmul.f32 %v2538_v9, %v806_v37  ;;  %v842_v46 = vmul.f32 %v2541_v10, %v807_v38  ;;  %v843_v47 = vmul.f32 %v2546_v25, %v819_v39 }
 0x11e   : > { %3243 = vst [vmem:[#allocation23_spill] sm:$0xff] %v2570_v12 }
 0x11f   : > { %v849_v50 = vpop.permute.xlu0 %848  ;;  %v851_v52 = vpop.permute.xlu1 %850  ;;  %v845_v53 = vpack.c.bf16 %v841_v45, %v837_v1  ;;  %v847_v54 = vpack.c.bf16 %v843_v47, %v839_v41  ;;  %v846_v55 = vpack.c.bf16 %v842_v46, %v838_v5 }
 0x120   : > { %v865_v1 = vsel %vm864_vm7, %v849_v50, %v851_v52 }
 0x121   : > { %949 = vmatprep.subr.bf16.mxu0 %v845_v53  ;;  %992 = vmatprep.subr.bf16.mxu1 %v847_v54  ;;  %v899_v46 = vmul.f32 %v2579_v11, %v865_v1  ;;  %v1845_v53 = vld [vmem:[%s3162_s2] ss:$8 sps:$4 sm:$0xff]  }
 0x122   : > { %950 = vmatpush1.bf16.msra.mxu0 %v844_v58  ;;  %993 = vmatpush1.bf16.msra.mxu1 %v846_v55 }
 0x123   : > { %v853_v59 = vpop.permute.xlu0 %852  ;;  %v855_v60 = vpop.permute.xlu1 %854 }
 0x124   : > { %v866_v22 = vsel %vm864_vm7, %v851_v52, %v853_v59  ;;  %v867_v26 = vsel %vm864_vm7, %v853_v59, %v855_v60  ;;  %v881_v15 = vsel %vm864_vm7, %v855_v60, %v849_v50 }
 0x125   : > { %v900_v18 = vmul.f32 %v2567_v63, %v866_v22  ;;  %v901_v5 = vmul.f32 %v2570_v12, %v867_v26  ;;  %v902_v19 = vmul.f32 %v2575_v6, %v881_v15 }
 0x127   : > { %v857_v13 = vpop.permute.xlu0 %856  ;;  %v859_v14 = vpop.permute.xlu1 %858 }
 0x128   : > { %v868_v31 = vsel %vm864_vm7, %v857_v13, %v859_v14 }
 0x129   : > { %v903_v36 = vmul.f32 %v2579_v11, %v868_v31 }
 0x12b   : > { %v861_v4 = vpop.permute.xlu0 %860  ;;  %v863_v32 = vpop.permute.xlu1 %862  ;;  %v907_v52 = vpack.c.bf16 %v903_v36, %v899_v46 }
 0x12c   : > { %v869_v16 = vsel %vm864_vm7, %v859_v14, %v861_v4  ;;  %v870_v37 = vsel %vm864_vm7, %v861_v4, %v863_v32  ;;  %v882_v38 = vsel %vm864_vm7, %v863_v32, %v857_v13 }
 0x12d   : > { %v904_v39 = vmul.f32 %v2567_v63, %v869_v16  ;;  %v905_v41 = vmul.f32 %v2570_v12, %v870_v37  ;;  %v906_v45 = vmul.f32 %v2575_v6, %v882_v38 }
 0x12f   : > { %v908_v47 = vpack.c.bf16 %v904_v39, %v900_v18  ;;  %v910_v48 = vpack.c.bf16 %v906_v45, %v902_v19  ;;  %v909_v50 = vpack.c.bf16 %v905_v41, %v901_v5 }
 0x131   : > { %951 = vmatprep.subr.bf16.mxu0 %v908_v47  ;;  %994 = vmatprep.subr.bf16.mxu1 %v910_v48 }
 0x132   : > { %952 = vmatpush1.bf16.msra.mxu0 %v907_v52  ;;  %995 = vmatpush1.bf16.msra.mxu1 %v909_v50 }
 0x135   : > { %968 = vmatmul.mubr.bf16.vlgmr.msra.gmra.mrb[0].mxu0 %v1845_v53  ;;  %1011 = vmatmul.mubr.bf16.vlgmr.msra.gmra.mrb[0].mxu1 %v1845_v53  ;;  %v1848_v53 = vld [vmem:[%s3164_s4 + $0x4] ss:$8 sps:$4 sm:$0xff]  }
 0x136   : > { %1773 = vmatprep.mubr.msk.bf16.mxu0 %vm484_vm0, %v1848_v53  ;;  %1774 = vmatprep.mubr.msk.bf16.mxu1 %vm484_vm0, %v1848_v53 }
 0x13c   : > { %v916_v54 = vpop.permute.xlu0 %915  ;;  %v921_v36 = vpop.permute.xlu1 %920 }
 0x208   : > { %v969_v55 = vpop.f32.mrb[0].mxu0  ;;  %v1012_v58 = vpop.f32.mrb[0].mxu1 }
 0x209   : > { %v970_v59 = vadd.f32 %v969_v55, %v916_v54  ;;  %v971_v60 = vpop.f32.mrb[1].mxu0  ;;  %v1014_v61 = vpop.f32.mrb[1].mxu1  ;;  %v1013_v31 = vadd.f32 %v1012_v58, %v916_v54 }
 0x20a   : > { %v972_v13 = vadd.f32 %v971_v60, %v916_v54  ;;  %v1016_v14 = vpop.f32.mrb[2].mxu1  ;;  %v973_v22 = vpop.f32.mrb[2].mxu0  ;;  %v1015_v4 = vadd.f32 %v1014_v61, %v916_v54  ;;  %v1411_v61 = vld [vmem:[%s3165_s5] sm:$0xff] }
 0x20b   : > { %v2597_v26 = vmax.f32 %v970_v59, 0.0  ;;  %v975_v15 = vpop.f32.mrb[3].mxu0  ;;  %v1018_v1 = vpop.f32.mrb[3].mxu1  ;;  %v2605_v5 = vmax.f32 %v1013_v31, 0.0  ;;  %v974_v16 = vadd.f32 %v973_v22, %v921_v36  ;;  %v1017_v37 = vadd.f32 %v1016_v14, %v921_v36  ;;  %v1412_v14 = vld [vmem:[%s3165_s5 + $0x8] sm:$0xff] }
 0x20c   : > { %v2599_v18 = vmax.f32 %v972_v13, 0.0  ;;  %v2623_v32 = vmax.f32 %v1015_v4, 0.0  ;;  %v1019_v39 = vadd.f32 %v1018_v1, %v921_v36  ;;  %v976_v45 = vadd.f32 %v975_v15, %v921_v36 }
 0x20d   : > { %3246 = vst [vmem:[#allocation26_spill] sm:$0xff] %v2597_v26  ;;  %1045 = vrot.lane.b32.xlu1 %v2597_v26, %s1977_s22  ;;  %v2645_v38 = vmax.f32 %v974_v16, 0.0  ;;  %v2651_v19 = vmax.f32 %v1017_v37, 0.0 }
 0x20e   : > { %1047 = vrot.lane.b32.xlu0 %v2599_v18, %s1977_s22  ;;  %v2681_v41 = vmax.f32 %v1019_v39, 0.0  ;;  %v2703_v46 = vmax.f32 %v976_v45, 0.0 }
 0x20f   : > { %3251 = vst [vmem:[#allocation27_spill] sm:$0xff] %v2645_v38 }
 0x210   : > { %3252 = vst [vmem:[#allocation28_spill] sm:$0xff] %v2703_v46 }
 0x211   : > { %1049 = vrot.lane.b32.xlu1 %v2605_v5, %s1977_s22 }
 0x212   : > { %1093 = vrot.lane.b32.xlu0 %v2599_v18, %s1978_s24 }
 0x215   : > { %1091 = vrot.lane.b32.xlu1 %v2597_v26, %s1978_s24 }
 0x216   : > { %1139 = vrot.lane.b32.xlu0 %v2599_v18, %s1979_s12 }
 0x219   : > { %1095 = vrot.lane.b32.xlu1 %v2605_v5, %s1978_s24 }
 0x21a   : > { %1185 = vrot.lane.b32.xlu0 %v2599_v18, %s3247_s30 }
 0x21d   : > { %1137 = vrot.lane.b32.xlu1 %v2597_v26, %s1979_s12 }
 0x21e   : > { %1229 = vrot.lane.b32.xlu0 %v2599_v18, %s3248_s29 }
 0x221   : > { %1141 = vrot.lane.b32.xlu1 %v2605_v5, %s1979_s12 }
 0x222   : > { %1233 = vrot.lane.b32.xlu0 %v2623_v32, %s3248_s29 }
 0x225   : > { %1183 = vrot.lane.b32.xlu1 %v2597_v26, %s3247_s30 }
 0x226   : > { %1275 = vrot.lane.b32.xlu0 %v2599_v18, %s3249_s23 }
 0x229   : > { %1187 = vrot.lane.b32.xlu1 %v2605_v5, %s3247_s30 }
 0x22a   : > { %1279 = vrot.lane.b32.xlu0 %v2623_v32, %s3249_s23 }
 0x22d   : > { %1227 = vrot.lane.b32.xlu1 %v2597_v26, %s3248_s29 }
 0x22e   : > { %1321 = vrot.lane.b32.xlu0 %v2599_v18, %s3250_s28 }
 0x231   : > { %1231 = vrot.lane.b32.xlu1 %v2605_v5, %s3248_s29 }
 0x232   : > { %1325 = vrot.lane.b32.xlu0 %v2623_v32, %s3250_s28 }
 0x235   : > { %1273 = vrot.lane.b32.xlu1 %v2597_v26, %s3249_s23 }
 0x236   : > { %1051 = vrot.lane.b32.xlu0 %v2645_v38, %s1977_s22 }
 0x239   : > { %1277 = vrot.lane.b32.xlu1 %v2605_v5, %s3249_s23 }
 0x23a   : > { %1055 = vrot.lane.b32.xlu0 %v2651_v19, %s1977_s22 }
 0x23d   : > { %1319 = vrot.lane.b32.xlu1 %v2597_v26, %s3250_s28 }
 0x23e   : > { %1097 = vrot.lane.b32.xlu0 %v2645_v38, %s1978_s24 }
 0x241   : > { %1323 = vrot.lane.b32.xlu1 %v2605_v5, %s3250_s28 }
 0x242   : > { %1101 = vrot.lane.b32.xlu0 %v2651_v19, %s1978_s24 }
 0x245   : > { %1033 = vrot.lane.b32.xlu1 %v2623_v32, %s1977_s22 }
 0x246   : > { %1143 = vrot.lane.b32.xlu0 %v2645_v38, %s1979_s12 }
 0x249   : > { %1085 = vrot.lane.b32.xlu1 %v2623_v32, %s1978_s24 }
 0x24a   : > { %1147 = vrot.lane.b32.xlu0 %v2651_v19, %s1979_s12 }
 0x24d   : > { %1131 = vrot.lane.b32.xlu1 %v2623_v32, %s1979_s12 }
 0x24e   : > { %1189 = vrot.lane.b32.xlu0 %v2645_v38, %s3247_s30 }
 0x251   : > { %1177 = vrot.lane.b32.xlu1 %v2623_v32, %s3247_s30 }
 0x252   : > { %1193 = vrot.lane.b32.xlu0 %v2651_v19, %s3247_s30 }
 0x255   : > { %1235 = vrot.lane.b32.xlu1 %v2645_v38, %s3248_s29 }
 0x256   : > { %1035 = vrot.lane.b32.xlu0 %v2681_v41, %s1977_s22 }
 0x259   : > { %1239 = vrot.lane.b32.xlu1 %v2651_v19, %s3248_s29 }
 0x25a   : > { %1087 = vrot.lane.b32.xlu0 %v2681_v41, %s1978_s24 }
 0x25d   : > { %1281 = vrot.lane.b32.xlu1 %v2645_v38, %s3249_s23 }
 0x25e   : > { %1133 = vrot.lane.b32.xlu0 %v2681_v41, %s1979_s12 }
 0x261   : > { %1285 = vrot.lane.b32.xlu1 %v2651_v19, %s3249_s23 }
 0x262   : > { %1179 = vrot.lane.b32.xlu0 %v2681_v41, %s3247_s30 }
 0x265   : > { %1327 = vrot.lane.b32.xlu1 %v2645_v38, %s3250_s28 }
 0x266   : > { %1367 = vrot.lane.b32.xlu0 %v2599_v18, %s1984_s18 }
 0x269   : > { %1053 = vrot.lane.b32.xlu1 %v2703_v46, %s1977_s22 }
 0x26a   : > { %1371 = vrot.lane.b32.xlu0 %v2623_v32, %s1984_s18 }
 0x26d   : > { %1099 = vrot.lane.b32.xlu1 %v2703_v46, %s1978_s24 }
 0x26e   : > { %1237 = vrot.lane.b32.xlu0 %v2703_v46, %s3248_s29 }
 0x271   : > { %1145 = vrot.lane.b32.xlu1 %v2703_v46, %s1979_s12  ;;  %s3305_s12 = sshll.u32 %s2151_s27, 6 }
 0x272   : > { %1241 = vrot.lane.b32.xlu0 %v2681_v41, %s3248_s29  ;;  %s377_s20 = scalar_lea.vmem [#allocation5], %s3305_s12 }
 0x273   : > { %s1685_s21 = sshll.u32 %s377_s20, 4  ;;  %s3109_s21 = int_to_ptr.vmem [resolvable:$true] %s1685_s21 }
 0x275   : > { %1191 = vrot.lane.b32.xlu1 %v2703_v46, %s3247_s30  ;;  %s1781_s30 = sshll.u32 %s2066_s17, 9 }
 0x276   : > { %1283 = vrot.lane.b32.xlu0 %v2703_v46, %s3249_s23  ;;  %s3116_s29 = scalar_lea.hbm %s3170_s10, %s1781_s30 }
 0x279   : > { %1331 = vrot.lane.b32.xlu1 %v2651_v19, %s3250_s28 }
 0x27a   : > { %1287 = vrot.lane.b32.xlu0 %v2681_v41, %s3249_s23  ;;  %s1672_s23 = scalar_lea.sflag [#allocation4], %s2151_s27 }
 0x27d   : > { %1365 = vrot.lane.b32.xlu1 %v2597_v26, %s1984_s18 }
 0x27e   : > { %1329 = vrot.lane.b32.xlu0 %v2703_v46, %s3250_s28 }
 0x27f   : > { %v2729_v47 = vpop.permute.xlu1 %1045 }
 0x280   : > { %v1048_v48 = vpop.permute.xlu0 %1047 }
 0x281   : > { %v2733_v50 = vsel %vm421_vm1, %v2729_v47, %v1048_v48  ;;  %1369 = vrot.lane.b32.xlu1 %v2605_v5, %s1984_s18 }
 0x282   : > { %1333 = vrot.lane.b32.xlu0 %v2681_v41, %s3250_s28  ;;  %s1905_s28 = scalar_lea.vmem %s3109_s21, 1024 }
 0x283   : > { %v2739_v52 = vpop.permute.xlu1 %1049  ;;  %p1906_p6 = scmp.ne.s32.totalorder %s3109_s21, %s1905_s28 }
 0x284   : > { %v2746_v54 = vsel %vm421_vm1, %v1048_v48, %v2739_v52  ;;  %v1094_v55 = vpop.permute.xlu0 %1093 }
 0x285   : > { %1373 = vrot.lane.b32.xlu1 %v2645_v38, %s1984_s18  ;;  %p1907_p12 = pnand %p1906_p6, %p3306_p11 }
 0x286   : > { %1375 = vrot.lane.b32.xlu0 %v2703_v46, %s1984_s18 }
 0x287   : > { %v2754_v58 = vpop.permute.xlu1 %1091  ;;  %p1908_p13 = pneg %p1907_p12 }
 0x288   : > { %v2758_v59 = vsel %vm484_vm0, %v2754_v58, %v1094_v55  ;;  %v1140_v60 = vpop.permute.xlu0 %1139 }
 0x289   : > { %1377 = vrot.lane.b32.xlu1 %v2651_v19, %s1984_s18 }
 0x28a   : > { %1379 = vrot.lane.b32.xlu0 %v2681_v41, %s1984_s18 }
 0x28b   : > { %v2767_v13 = vpop.permute.xlu1 %1095 }
 0x28c   : > { %v2774_v22 = vsel %vm484_vm0, %v1094_v55, %v2767_v13  ;;  %v1186_v31 = vpop.permute.xlu0 %1185 }
 0x28d   : > { %1415 = vperm.xlu1 %1844, %v1411_v61  }
 0x28e   : > { %1420 = vperm.xlu0 %1843, %v1412_v14  }
 0x28f   : > { %v2776_v15 = vpop.permute.xlu1 %1137 }
 0x290   : > { %v2780_v1 = vsel %vm547_vm2, %v2776_v15, %v1140_v60  ;;  %v1230_v4 = vpop.permute.xlu0 %1229 }
 0x293   : > { %v2782_v36 = vpop.permute.xlu1 %1141 }
 0x294   : > { %v2786_v16 = vsel %vm547_vm2, %v1140_v60, %v2782_v36  ;;  %v1234_v37 = vpop.permute.xlu0 %1233 }
 0x297   : > { %v2788_v39 = vpop.permute.xlu1 %1183 }
 0x298   : > { %v2792_v45 = vsel %vm610_vm3, %v2788_v39, %v1186_v31  ;;  %v1276_v48 = vpop.permute.xlu0 %1275 }
 0x29b   : > { %v2794_v53 = vpop.permute.xlu1 %1187 }
 0x29c   : > { %v2798_v55 = vsel %vm610_vm3, %v1186_v31, %v2794_v53  ;;  %v1280_v61 = vpop.permute.xlu0 %1279 }
 0x29f   : > { %v1228_v14 = vpop.permute.xlu1 %1227 }
 0x2a0   : > { %v2801_v17 = vsel %vm675_vm4, %v1228_v14, %v1230_v4  ;;  %v2804_v60 = vsel %vm675_vm4, %v1234_v37, %v1228_v14  ;;  %v1322_v12 = vpop.permute.xlu0 %1321 }
 0x2a1   : > { %3253 = vst [vmem:[#allocation29_spill] sm:$0xff] %v2801_v17  ;;  %3254 = vst [vmem:[#allocation30_spill] sm:$0xff] %v2804_v60 }
 0x2a3   : > { %v1232_v63 = vpop.permute.xlu1 %1231 }
 0x2a4   : > { %v2807_v6 = vsel %vm675_vm4, %v1230_v4, %v1232_v63  ;;  %v2810_v11 = vsel %vm675_vm4, %v1232_v63, %v1234_v37  ;;  %v1326_v10 = vpop.permute.xlu0 %1325 }
 0x2a5   : > { %3255 = vst [vmem:[#allocation31_spill] sm:$0xff] %v2807_v6  ;;  %3256 = vst [vmem:[#allocation32_spill] sm:$0xff] %v2810_v11 }
 0x2a7   : > { %v1274_v27 = vpop.permute.xlu1 %1273 }
 0x2a8   : > { %v2813_v31 = vsel %vm738_vm5, %v1274_v27, %v1276_v48  ;;  %v2816_v25 = vsel %vm738_vm5, %v1280_v61, %v1274_v27  ;;  %v1052_v9 = vpop.permute.xlu0 %1051 }
 0x2a9   : > { %3257 = vst [vmem:[#allocation33_spill] sm:$0xff] %v2813_v31  ;;  %3258 = vst [vmem:[#allocation34_spill] sm:$0xff] %v2816_v25 }
 0x2ab   : > { %v1278_v21 = vpop.permute.xlu1 %1277 }
 0x2ac   : > { %v2819_v14 = vsel %vm738_vm5, %v1276_v48, %v1278_v21  ;;  %v2822_v29 = vsel %vm738_vm5, %v1278_v21, %v1280_v61  ;;  %v1056_v4 = vpop.permute.xlu0 %1055 }
 0x2ad   : > { %3259 = vst [vmem:[#allocation35_spill] sm:$0xff] %v2819_v14  ;;  %3260 = vst [vmem:[#allocation36_spill] sm:$0xff] %v2822_v29 }
 0x2af   : > { %v1320_v3 = vpop.permute.xlu1 %1319 }
 0x2b0   : > { %v2825_v63 = vsel %vm801_vm6, %v1320_v3, %v1322_v12  ;;  %v2828_v37 = vsel %vm801_vm6, %v1326_v10, %v1320_v3  ;;  %v1098_v31 = vpop.permute.xlu0 %1097 }
 0x2b1   : > { %3261 = vst [vmem:[#allocation37_spill] sm:$0xff] %v2825_v63  ;;  %3262 = vst [vmem:[#allocation38_spill] sm:$0xff] %v2828_v37 }
 0x2b3   : > { %v1324_v11 = vpop.permute.xlu1 %1323 }
 0x2b4   : > { %v2831_v27 = vsel %vm801_vm6, %v1322_v12, %v1324_v11  ;;  %v2834_v25 = vsel %vm801_vm6, %v1324_v11, %v1326_v10  ;;  %v1102_v48 = vpop.permute.xlu0 %1101 }
 0x2b5   : > { %3263 = vst [vmem:[#allocation39_spill] sm:$0xff] %v2831_v27  ;;  %3264 = vst [vmem:[#allocation40_spill] sm:$0xff] %v2834_v25 }
 0x2b7   : > { %v1034_v14 = vpop.permute.xlu1 %1033 }
 0x2b8   : > { %v2836_v21 = vpop.permute.xlu0 %1143  ;;  %v1059_v12 = vsel %vm421_vm1, %v2739_v52, %v1034_v14 }
 0x2b9   : > { %v1076_v25 = vmul.f32 %v1059_v12, %v2347_v24  ;;  %v1074_v12 = vmul.f32 %v2733_v50, %v2343_v23  ;;  %v1071_v50 = vsel %vm421_vm1, %v1034_v14, %v2729_v47  ;;  %v2896_v14 = vmul.f32 %v2786_v16, %v2417_v44 }
 0x2bb   : > { %v1086_v61 = vpop.permute.xlu1 %1085 }
 0x2bc   : > { %v2838_v29 = vpop.permute.xlu0 %1147 }
 0x2bf   : > { %v1132_v20 = vpop.permute.xlu1 %1131 }
 0x2c0   : > { %v2840_v63 = vpop.permute.xlu0 %1189 }
 0x2c3   : > { %v2842_v3 = vpop.permute.xlu1 %1177 }
 0x2c4   : > { %v2844_v37 = vpop.permute.xlu0 %1193 }
 0x2c7   : > { %v2848_v27 = vpop.permute.xlu1 %1235 }
 0x2c8   : > { %v1036_v10 = vpop.permute.xlu0 %1035 }
 0x2c9   : > { %v1062_v11 = vsel %vm421_vm1, %v1056_v4, %v1036_v10 }
 0x2ca   : > { %v1080_v2 = vmul.f32 %v1062_v11, %v2347_v24  ;;  %v1072_v24 = vsel %vm421_vm1, %v1036_v10, %v1052_v9  ;;  %v1075_v11 = vmul.f32 %v2746_v54, %v2354_v28  ;;  %v1105_v10 = vsel %vm484_vm0, %v2767_v13, %v1086_v61 }
 0x2cb   : > { %v2853_v6 = vpop.permute.xlu1 %1239  ;;  %v1117_v54 = vsel %vm484_vm0, %v1086_v61, %v2754_v58 }
 0x2cc   : > { %v1088_v38 = vpop.permute.xlu0 %1087  ;;  %v1084_v26 = vpack.c.bf16 %v1080_v2, %v1076_v25  ;;  %v1120_v2 = vmul.f32 %v2758_v59, %v2385_v56  ;;  %v1121_v25 = vmul.f32 %v2774_v22, %v2388_v57  ;;  %v1077_v59 = vmul.f32 %v1072_v24, %v2363_v30 }
 0x2cd   : > { %v1118_v22 = vsel %vm484_vm0, %v1088_v38, %v1098_v31 }
 0x2ce   : > { %1478 = vmatprep.subr.bf16.mxu1 %v1084_v26  ;;  %v1108_v26 = vsel %vm484_vm0, %v1102_v48, %v1088_v38  ;;  %v1073_v38 = vmul.f32 %v1071_v50, %v2363_v30  ;;  %v1123_v61 = vmul.f32 %v1118_v22, %v2397_v8 }
 0x2cf   : > { %v2855_v60 = vpop.permute.xlu1 %1281  ;;  %v1126_v46 = vmul.f32 %v1108_v26, %v2393_v62 }
 0x2d0   : > { %3265 = vst [vmem:[#allocation41_spill] sm:$0xff] %v2855_v60  ;;  %v1134_v17 = vpop.permute.xlu0 %1133 }
 0x2d1   : > { %v1154_v47 = vsel %vm547_vm2, %v2838_v29, %v1134_v17  ;;  %v1164_v50 = vsel %vm547_vm2, %v1134_v17, %v2836_v21  ;;  %v1197_v17 = vsel %vm610_vm3, %v2794_v53, %v2842_v3 }
 0x2d3   : > { %v2857_v33 = vpop.permute.xlu1 %1285 }
 0x2d4   : > { %3266 = vst [vmem:[#allocation42_spill] sm:$0xff] %v2857_v33  ;;  %v1180_v52 = vpop.permute.xlu0 %1179 }
 0x2d7   : > { %v2859_v7 = vpop.permute.xlu1 %1327 }
 0x2d8   : > { %3267 = vst [vmem:[#allocation43_spill] sm:$0xff] %v2859_v7  ;;  %v2861_v0 = vpop.permute.xlu0 %1367  ;;  %v2875_v7 = vmul.f32 %v2780_v1, %v2414_v43 }
 0x2d9   : > { %3268 = vst [vmem:[#allocation44_spill] sm:$0xff] %v2861_v0 }
 0x2db   : > { %v1054_v0 = vpop.permute.xlu1 %1053 }
 0x2dc   : > { %v1060_v60 = vsel %vm421_vm1, %v1052_v9, %v1054_v0  ;;  %v1061_v33 = vsel %vm421_vm1, %v1054_v0, %v1056_v4  ;;  %v2887_v1 = vpop.permute.xlu0 %1371  ;;  %v1119_v9 = vmul.f32 %v1117_v54, %v2397_v8  ;;  %v1122_v0 = vmul.f32 %v1105_v10, %v2393_v62 }
 0x2dd   : > { %v1078_v13 = vmul.f32 %v1060_v60, %v2343_v23  ;;  %v1079_v58 = vmul.f32 %v1061_v33, %v2354_v28  ;;  %v1151_v4 = vsel %vm547_vm2, %v2782_v36, %v1132_v20  ;;  %v1081_v60 = vpack.c.bf16 %v1077_v59, %v1073_v38 }
 0x2de   : > { %v1172_v28 = vmul.f32 %v1154_v47, %v2422_v49  ;;  %v1130_v8 = vpack.c.bf16 %v1126_v46, %v1122_v0  ;;  %v1169_v46 = vmul.f32 %v1164_v50, %v2426_v51  ;;  %v1210_v59 = vsel %vm610_vm3, %v1180_v52, %v2840_v63  ;;  %v3272_v50 = vld [vmem:[#allocation42_spill] sm:$0xff] }
 0x2df   : > { %v1083_v24 = vpack.c.bf16 %v1079_v58, %v1075_v11  ;;  %v1100_v26 = vpop.permute.xlu1 %1099  ;;  %v1082_v23 = vpack.c.bf16 %v1078_v13, %v1074_v12  ;;  %v1163_v12 = vsel %vm547_vm2, %v1132_v20, %v2776_v15  ;;  %v1168_v11 = vmul.f32 %v1151_v4, %v2422_v49 }
 0x2e0   : > { %v1106_v33 = vsel %vm484_vm0, %v1098_v31, %v1100_v26  ;;  %v1107_v16 = vsel %vm484_vm0, %v1100_v26, %v1102_v48  ;;  %v1238_v30 = vpop.permute.xlu0 %1237  ;;  %v1200_v31 = vsel %vm610_vm3, %v2844_v37, %v1180_v52  ;;  %v1127_v48 = vpack.c.bf16 %v1123_v61, %v1119_v9  ;;  %v3269_v26 = vld [vmem:[#allocation28_spill] sm:$0xff] }
 0x2e1   : > { %v1124_v62 = vmul.f32 %v1106_v33, %v2385_v56  ;;  %v1125_v36 = vmul.f32 %v1107_v16, %v2388_v57  ;;  %1435 = vmatprep.subr.bf16.mxu0 %v1082_v23  ;;  %1479 = vmatpush1.bf16.msra.mxu1 %v1083_v24  ;;  %v1176_v54 = vpack.c.bf16 %v1172_v28, %v1168_v11  ;;  %v3271_v33 = vld [vmem:[#allocation12_spill] sm:$0xff] }
 0x2e2   : > { %1436 = vmatpush1.bf16.msra.mxu0 %v1081_v60  ;;  %1480 = vmatprep.subr.bf16.mxu1 %v1130_v8  ;;  %v1218_v53 = vmul.f32 %v1200_v31, %v2451_v40  ;;  %v1214_v52 = vmul.f32 %v1197_v17, %v2451_v40  ;;  %v1215_v58 = vmul.f32 %v1210_v59, %v2455_v42  ;;  %v3270_v60 = vld [vmem:[#allocation10_spill] sm:$0xff]  ;;  %v3280_v17 = vld [vmem:[#allocation11_spill] sm:$0xff]  ;;  %v3283_v59 = vld [vmem:[#allocation32_spill] sm:$0xff] }
 0x2e3   : > { %v1129_v56 = vpack.c.bf16 %v1125_v36, %v1121_v25  ;;  %v1146_v57 = vpop.permute.xlu1 %1145  ;;  %v1128_v10 = vpack.c.bf16 %v1124_v62, %v1120_v2  ;;  %v1212_v2 = vmul.f32 %v2792_v45, %v2443_v34  ;;  %v1247_v9 = vsel %vm675_vm4, %v1238_v30, %v2853_v6  ;;  %v3278_v36 = vld [vmem:[#allocation27_spill] sm:$0xff] }
 0x2e4   : > { %v1152_v20 = vsel %vm547_vm2, %v2836_v21, %v1146_v57  ;;  %v1153_v49 = vsel %vm547_vm2, %v1146_v57, %v2838_v29  ;;  %v1242_v15 = vpop.permute.xlu0 %1241  ;;  %v1165_v21 = vmul.f32 %v1163_v12, %v2426_v51  ;;  %v1209_v29 = vsel %vm610_vm3, %v2842_v3, %v2788_v39  ;;  %v3279_v12 = vld [vmem:[#allocation31_spill] sm:$0xff] }
 0x2e5   : > { %v1170_v25 = vmul.f32 %v1152_v20, %v2414_v43  ;;  %v1171_v22 = vmul.f32 %v1153_v49, %v2417_v44  ;;  %1437 = vmatprep.subr.bf16.mxu0 %v1128_v10  ;;  %1481 = vmatpush1.bf16.msra.mxu1 %v1129_v56  ;;  %v1213_v39 = vmul.f32 %v2798_v55, %v2446_v35  ;;  %v3281_v10 = vld [vmem:[#allocation14_spill] sm:$0xff]  ;;  %v3282_v49 = vld [vmem:[#allocation16_spill] sm:$0xff] }
 0x2e6   : > { %1438 = vmatpush1.bf16.msra.mxu0 %v1127_v48  ;;  %1482 = vmatprep.subr.bf16.mxu1 %v1176_v54  ;;  %v1173_v13 = vpack.c.bf16 %v1169_v46, %v1165_v21  ;;  %v1248_v61 = vsel %vm675_vm4, %v2853_v6, %v1242_v15  ;;  %v1224_v23 = vpack.c.bf16 %v3269_v26, %v2599_v18  ;;  %v3276_v6 = vld [vmem:[#allocation30_spill] sm:$0xff] }
 0x2e7   : > { %v1175_v47 = vpack.c.bf16 %v1171_v22, %v2896_v14  ;;  %v1192_v43 = vpop.permute.xlu1 %1191  ;;  %v1174_v44 = vpack.c.bf16 %v1170_v25, %v2875_v7  ;;  %v1222_v14 = vpack.c.bf16 %v1218_v53, %v1214_v52  ;;  %v1211_v7 = vmul.f32 %v1209_v29, %v2455_v42  ;;  %v3277_v18 = vld [vmem:[#allocation26_spill] sm:$0xff]  ;;  %v3284_v25 = vld [vmem:[#allocation17_spill] sm:$0xff] }
 0x2e8   : > { %v1198_v51 = vsel %vm610_vm3, %v2840_v63, %v1192_v43  ;;  %v1199_v45 = vsel %vm610_vm3, %v1192_v43, %v2844_v37  ;;  %v1284_v38 = vpop.permute.xlu0 %1283  ;;  %v1260_v63 = vsel %vm675_vm4, %v1242_v15, %v2848_v27  ;;  %v1246_v42 = vsel %vm675_vm4, %v2848_v27, %v1238_v30  ;;  %v3275_v27 = vld [vmem:[#allocation29_spill] sm:$0xff]  ;;  %v3286_v52 = vld [vmem:[#allocation34_spill] sm:$0xff]  ;;  %v3287_v43 = vld [vmem:[#allocation35_spill] sm:$0xff] }
 0x2e9   : > { %v1216_v40 = vmul.f32 %v1198_v51, %v2443_v34  ;;  %v1217_v3 = vmul.f32 %v1199_v45, %v2446_v35  ;;  %1439 = vmatprep.subr.bf16.mxu0 %v1174_v44  ;;  %1483 = vmatpush1.bf16.msra.mxu1 %v1175_v47  ;;  %v1226_v34 = vpack.c.bf16 %v2681_v41, %v2623_v32  ;;  %v3273_v41 = vld [vmem:[#allocation41_spill] sm:$0xff]  ;;  %v3289_v51 = vld [vmem:[#allocation36_spill] sm:$0xff] }
 0x2ea   : > { %1440 = vmatpush1.bf16.msra.mxu0 %v1173_v13  ;;  %1484 = vmatprep.subr.bf16.mxu1 %v1222_v14  ;;  %v1225_v35 = vpack.c.bf16 %v2651_v19, %v2605_v5  ;;  %v1219_v4 = vpack.c.bf16 %v1215_v58, %v1211_v7  ;;  %v1266_v28 = vmul.f32 %v1247_v9, %v3270_v60  ;;  %v3274_v19 = vld [vmem:[#allocation13_spill] sm:$0xff]  ;;  %v3288_v58 = vld [vmem:[#allocation15_spill] sm:$0xff] }
 0x2eb   : > { %v1221_v37 = vpack.c.bf16 %v1217_v3, %v1213_v39  ;;  %v1332_v0 = vpop.permute.xlu1 %1331  ;;  %v1220_v55 = vpack.c.bf16 %v1216_v40, %v1212_v2  ;;  %v1268_v16 = vmul.f32 %v1260_v63, %v3271_v33  ;;  %v1293_v32 = vsel %vm738_vm5, %v1284_v38, %v3272_v50  ;;  %v3285_v22 = vld [vmem:[#allocation33_spill] sm:$0xff] }
 0x2ec   : > { %v1288_v24 = vpop.permute.xlu0 %1287  ;;  %v1261_v30 = vmul.f32 %v3275_v27, %v3274_v19  ;;  %v1264_v62 = vmul.f32 %v3276_v6, %v3271_v33  ;;  %v1223_v8 = vpack.c.bf16 %v3278_v36, %v3277_v18  ;;  %v1262_v11 = vmul.f32 %v3279_v12, %v3270_v60  ;;  %v3297_v27 = vld [vmem:[#allocation19_spill] sm:$0xff] }
 0x2ed   : > { %v1306_v5 = vsel %vm738_vm5, %v1288_v24, %v3273_v41  ;;  %1441 = vmatprep.subr.bf16.mxu0 %v1220_v55  ;;  %1485 = vmatpush1.bf16.msra.mxu1 %v1221_v37  ;;  %v1265_v31 = vmul.f32 %v1246_v42, %v3274_v19  ;;  %v1267_v48 = vmul.f32 %v1248_v61, %v3280_v17  ;;  %v3290_v37 = vld [vmem:[#allocation43_spill] sm:$0xff]  ;;  %v3292_v61 = vld [vmem:[#allocation20_spill] sm:$0xff] }
 0x2ee   : > { %1442 = vmatpush1.bf16.msra.mxu0 %v1219_v4  ;;  %1486 = vmatprep.subr.bf16.mxu1 %v1226_v34  ;;  %v1292_v57 = vsel %vm738_vm5, %v3273_v41, %v1284_v38  ;;  %v1312_v46 = vmul.f32 %v1293_v32, %v3281_v10  ;;  %v1294_v20 = vsel %vm738_vm5, %v3272_v50, %v1288_v24  ;;  %v3291_v34 = vld [vmem:[#allocation18_spill] sm:$0xff]  ;;  %v3295_v50 = vld [vmem:[#allocation44_spill] sm:$0xff] }
 0x2ef   : > { %1443 = vmatprep.subr.bf16.mxu0 %v1224_v23  ;;  %v1366_v56 = vpop.permute.xlu1 %1365  ;;  %v1314_v15 = vmul.f32 %v1306_v5, %v3282_v49  ;;  %v1263_v53 = vmul.f32 %v3283_v59, %v3280_v17  ;;  %v1307_v2 = vmul.f32 %v3285_v22, %v3284_v25  ;;  %v1272_v21 = vpack.c.bf16 %v1268_v16, %v1264_v62  ;;  %v3293_v24 = vld [vmem:[#allocation38_spill] sm:$0xff]  ;;  %v3294_v23 = vld [vmem:[#allocation39_spill] sm:$0xff]  ;;  %v3296_v5 = vld [vmem:[#allocation21_spill] sm:$0xff] }
 0x2f0   : > { %v1330_v54 = vpop.permute.xlu0 %1329  ;;  %v1270_v29 = vpack.c.bf16 %v1266_v28, %v1262_v11  ;;  %v1310_v47 = vmul.f32 %v3286_v52, %v3282_v49  ;;  %v1308_v44 = vmul.f32 %v3287_v43, %v3281_v10  ;;  %v1309_v45 = vmul.f32 %v3289_v51, %v3288_v58  ;;  %v3299_v11 = vld [vmem:[#allocation40_spill] sm:$0xff]  ;;  %v3303_v52 = vld [vmem:[#allocation23_spill] sm:$0xff] }
 0x2f1   : > { %v1339_v13 = vsel %vm801_vm6, %v1330_v54, %v1332_v0  ;;  %1487 = vmatpush1.bf16.msra.mxu1 %v1225_v35  ;;  %v1311_v38 = vmul.f32 %v1292_v57, %v3284_v25  ;;  %v1313_v39 = vmul.f32 %v1294_v20, %v3288_v58  ;;  %v1269_v3 = vpack.c.bf16 %v1265_v31, %v1261_v30  ;;  %v3301_v57 = vld [vmem:[#allocation24_spill] sm:$0xff]  ;;  %v3302_v25 = vld [vmem:[#allocation22_spill] sm:$0xff] }
 0x2f2   : > { %1444 = vmatpush1.bf16.msra.mxu0 %v1223_v8  ;;  %1488 = vmatprep.subr.bf16.mxu1 %v1272_v21  ;;  %v1271_v14 = vpack.c.bf16 %v1267_v48, %v1263_v53  ;;  %v1318_v9 = vpack.c.bf16 %v1314_v15, %v1310_v47  ;;  %v1316_v63 = vpack.c.bf16 %v1312_v46, %v1308_v44  ;;  %v3298_v8 = vld [vmem:[#allocation37_spill] sm:$0xff] }
 0x2f3   : > { %v1370_v40 = vpop.permute.xlu1 %1369  ;;  %1445 = vmatprep.subr.bf16.mxu0 %v1270_v29  ;;  %v1338_v55 = vsel %vm801_vm6, %v3290_v37, %v1330_v54  ;;  %v1358_v35 = vmul.f32 %v1339_v13, %v3291_v34  ;;  %v1356_v26 = vmul.f32 %v3293_v24, %v3292_v61  ;;  %v1354_v60 = vmul.f32 %v3294_v23, %v3291_v34  ;;  %v3300_v48 = vld [vmem:[#allocation25_spill] sm:$0xff] }
 0x2f4   : > { %v1334_v7 = vpop.permute.xlu0 %1333  ;;  %v1315_v33 = vpack.c.bf16 %v1311_v38, %v1307_v2  ;;  %v1317_v16 = vpack.c.bf16 %v1313_v39, %v1309_v45  ;;  %v1381_v32 = vsel %vm864_vm7, %v1366_v56, %v3295_v50  ;;  %v1397_v41 = vsel %vm864_vm7, %v2887_v1, %v1366_v56  ;;  %v1850_v45 = vld [vmem:[%s3164_s4] ss:$8 sps:$4 sm:$0xff]  }
 0x2f5   : > { %v1340_v4 = vsel %vm801_vm6, %v1332_v0, %v1334_v7  ;;  %v1352_v42 = vsel %vm801_vm6, %v1334_v7, %v3290_v37  ;;  %1489 = vmatpush1.bf16.msra.mxu1 %v1271_v14  ;;  %v1357_v19 = vmul.f32 %v1338_v55, %v3296_v5  ;;  %v1362_v36 = vpack.c.bf16 %v1358_v35, %v1354_v60 }
 0x2f6   : > { %v1360_v28 = vmul.f32 %v1352_v42, %v3292_v61  ;;  %1446 = vmatpush1.bf16.msra.mxu0 %v1269_v3  ;;  %1490 = vmatprep.subr.bf16.mxu1 %v1318_v9  ;;  %v1359_v30 = vmul.f32 %v1340_v4, %v3297_v27  ;;  %v1353_v12 = vmul.f32 %v3298_v8, %v3296_v5 }
 0x2f7   : > { %v1374_v0 = vpop.permute.xlu1 %1373  ;;  %1447 = vmatprep.subr.bf16.mxu0 %v1316_v63  ;;  %v1355_v31 = vmul.f32 %v3299_v11, %v3297_v27  ;;  %v1382_v17 = vsel %vm864_vm7, %v3295_v50, %v1370_v40  ;;  %v1399_v56 = vmul.f32 %v1381_v32, %v3300_v48  ;;  %v1402_v10 = vmul.f32 %v1397_v41, %v3301_v57  ;;  %v1521_v50 = vld [vmem:[%s3166_s6] sm:$0xff]  ;;  %v1522_v41 = vld [vmem:[%s3166_s6 + $0x8] sm:$0xff] }
 0x2f8   : > { %v1376_v6 = vpop.permute.xlu0 %1375  ;;  %v1364_v62 = vpack.c.bf16 %v1360_v28, %v1356_v26  ;;  %v1383_v46 = vsel %vm864_vm7, %v1370_v40, %v2887_v1  ;;  %v1361_v49 = vpack.c.bf16 %v1357_v19, %v1353_v12  ;;  %v1400_v22 = vmul.f32 %v1382_v17, %v3302_v25 }
 0x2f9   : > { %v1384_v18 = vsel %vm864_vm7, %v1374_v0, %v1376_v6  ;;  %1491 = vmatpush1.bf16.msra.mxu1 %v1317_v16  ;;  %v1363_v15 = vpack.c.bf16 %v1359_v30, %v1355_v31  ;;  %v1401_v1 = vmul.f32 %v1383_v46, %v3303_v52 }
 0x2fa   : > { %1448 = vmatpush1.bf16.msra.mxu0 %v1315_v33  ;;  %1492 = vmatprep.subr.bf16.mxu1 %v1364_v62  ;;  %v1403_v54 = vmul.f32 %v1384_v18, %v3300_v48 }
 0x2fb   : > { %v1378_v20 = vpop.permute.xlu1 %1377  ;;  %1449 = vmatprep.subr.bf16.mxu0 %v1362_v36 }
 0x2fc   : > { %v1385_v59 = vsel %vm864_vm7, %v1376_v6, %v1378_v20  ;;  %v1380_v53 = vpop.permute.xlu0 %1379  ;;  %v1407_v13 = vpack.c.bf16 %v1403_v54, %v1399_v56 }
 0x2fd   : > { %v1404_v2 = vmul.f32 %v1385_v59, %v3302_v25  ;;  %v1386_v21 = vsel %vm864_vm7, %v1378_v20, %v1380_v53  ;;  %v1398_v29 = vsel %vm864_vm7, %v1380_v53, %v1374_v0  ;;  %1493 = vmatpush1.bf16.msra.mxu1 %v1363_v15  ;;  %v1523_v25 = vld [vmem:[%s3167_s7] sm:$0x1] }
 0x2fe   : > { %v1405_v47 = vmul.f32 %v1386_v21, %v3303_v52  ;;  %v1406_v43 = vmul.f32 %v1398_v29, %v3301_v57  ;;  %1450 = vmatpush1.bf16.msra.mxu0 %v1361_v49 }
 0x2ff   : > { %v1408_v44 = vpack.c.bf16 %v1404_v2, %v1400_v22 }
 0x300   : > { %v1409_v58 = vpack.c.bf16 %v1405_v47, %v1401_v1  ;;  %v1410_v51 = vpack.c.bf16 %v1406_v43, %v1402_v10  ;;  %v1525_v47 = vld [vmem:[%s3168_s8 + $0x8] sm:$0xff]  ;;  %v1524_v43 = vld [vmem:[%s3168_s8] sm:$0xff] }
 0x301   : > { %1451 = vmatprep.subr.bf16.mxu0 %v1408_v44  ;;  %v3304_v44 = vld [vmem:[#allocation9_spill] sm:$0xff] }
 0x302   : > { %1452 = vmatpush1.bf16.msra.mxu0 %v1407_v13  ;;  %1494 = vmatprep.subr.bf16.mxu1 %v1410_v51 }
 0x303   : > { %1495 = vmatpush1.bf16.msra.mxu1 %v1409_v58 }
 0x305   : > { %1468 = vmatmul.mubr.bf16.vlgmr.msra.gmra.mrb[4].mxu0 %v1850_v45 }
 0x306   : > { %1511 = vmatmul.mubr.bf16.vlgmr.msra.gmra.mrb[4].mxu1 %v1850_v45 }
 0x30c   : > { %v1416_v38 = vpop.permute.xlu1 %1415 }
 0x30d   : > { %v1421_v39 = vpop.permute.xlu0 %1420 }
 0x3d8   : > { %v1469_v40 = vpop.f32.mrb[4].mxu0 }
 0x3d9   : > { %v3037_v3 = vadd.f32 %v1469_v40, %v1416_v38  ;;  %v1471_v14 = vpop.f32.mrb[5].mxu0  ;;  %v1512_v7 = vpop.f32.mrb[4].mxu1 }
 0x3da   : > { %v3039_v9 = vadd.f32 %v1471_v14, %v1416_v38  ;;  %v1473_v63 = vpop.f32.mrb[6].mxu0  ;;  %v1514_v37 = vpop.f32.mrb[5].mxu1  ;;  %v3051_v23 = vadd.f32 %v1512_v7, %v1416_v38 }
 0x3db   : > { %v3041_v55 = vadd.f32 %v1473_v63, %v1421_v39  ;;  %v1475_v34 = vpop.f32.mrb[7].mxu0  ;;  %v1516_v35 = vpop.f32.mrb[6].mxu1  ;;  %v3053_v60 = vadd.f32 %v1514_v37, %v1416_v38 }
 0x3dc   : > { %v1528_v4 = vadd.f32 %v3039_v9, %v3037_v3  ;;  %v3045_v42 = vadd.f32 %v1475_v34, %v1421_v39  ;;  %v3047_v61 = vadd.f32 %v1516_v35, %v1421_v39  ;;  %v1518_v24 = vpop.f32.mrb[7].mxu1  ;;  %v1526_v35 = vld [vmem:[%s3169_s9] sm:$0xff] }
 0x3dd   : > { %v3049_v26 = vadd.f32 %v1518_v24, %v1421_v39  ;;  %v1600_v16 = vadd.f32 %v3053_v60, %v3051_v23 }
 0x3de   : > { %v1531_v28 = vadd.f32 %v3045_v42, %v3041_v55  ;;  %1529 = vadd.xlane.f32.xlu1 %v1528_v4  ;;  %v1527_v4 = vld [vmem:[%s3169_s9 + $0x8] sm:$0xff] }
 0x3df   : > { %v1603_v33 = vadd.f32 %v3049_v26, %v3047_v61 }
 0x3e0   : > { %1532 = vadd.xlane.f32.xlu0 %v1531_v28 }
 0x3e2   : > { %1604 = vadd.xlane.f32.xlu1 %v1603_v33 }
 0x3e4   : > { %1601 = vadd.xlane.f32.xlu0 %v1600_v16 }
 0x46b   : > { %v1530_v32 = vpop.xlane.xlu1 %1529 }
 0x46c   : > { %v1534_v0 = vmul.f32 0.00390625, %v1530_v32 }
 0x46d   : > { %v1533_v5 = vpop.xlane.xlu0 %1532 }
 0x46e   : > { %v1536_v19 = vmul.f32 %v1534_v0, %v1521_v50  ;;  %v1535_v27 = vmul.f32 0.00390625, %v1533_v5 }
 0x46f   : > { %v1605_v30 = vpop.xlane.xlu1 %1604 }
 0x470   : > { %v1537_v6 = vmul.f32 %v1535_v27, %v1522_v41  ;;  %v1607_v62 = vmul.f32 0.00390625, %v1605_v30  ;;  %v1539_v36 = vsel %vm1538_vm8, %v1536_v19, 0.0 }
 0x471   : > { %v1602_v18 = vpop.xlane.xlu0 %1601 }
 0x472   : > { %v1540_v8 = vsel %vm1538_vm8, %v1537_v6, 0.0  ;;  %v1609_v12 = vmul.f32 %v1607_v62, %v1522_v41  ;;  %v1606_v11 = vmul.f32 0.00390625, %v1602_v18 }
 0x473   : > { %v1541_v31 = vadd.f32 %v1540_v8, %v1539_v36 }
 0x474   : > { %v1608_v17 = vmul.f32 %v1606_v11, %v1521_v50  ;;  %v1611_v56 = vsel %vm1538_vm8, %v1609_v12, 0.0 }
 0x475   : > { %v1542_v48 = vrot.slane %v1541_v31, 4 }
 0x476   : > { %v1610_v57 = vsel %vm1538_vm8, %v1608_v17, 0.0 }
 0x477   : > { %v1543_v10 = vadd.f32 %v1542_v48, %v1541_v31  ;;  %v1612_v46 = vadd.f32 %v1611_v56, %v1610_v57 }
 0x479   : > { %v1544_v20 = vrot.slane %v1543_v10, 2  ;;  %v1613_v49 = vrot.slane %v1612_v46, 4 }
 0x47b   : > { %v1545_v15 = vadd.f32 %v1544_v20, %v1543_v10  ;;  %v1614_v54 = vadd.f32 %v1613_v49, %v1612_v46 }
 0x47d   : > { %v1546_v59 = vrot.slane %v1545_v15, 1  ;;  %v1615_v53 = vrot.slane %v1614_v54, 2 }
 0x47f   : > { %v1616_v22 = vadd.f32 %v1615_v53, %v1614_v54  ;;  %v1547_v2 = vadd.f32 %v1546_v59, %v1545_v15 }
 0x481   : > { %v1617_v21 = vrot.slane %v1616_v22, 1  ;;  %v1548_v29 = vadd.f32 %v1547_v2, %v1523_v25  ;;  %v1867_v2 = vld [vmem:[%s2157_s11] sm:$0xff] }
 0x483   : > { %v1549_v52 = vmax.f32 %v1548_v29, 0.0  ;;  %v1618_v1 = vadd.f32 %v1617_v21, %v1616_v22  ;;  %v1868_v29 = vld [vmem:[%s2157_s11 + $0x8] sm:$0xff] }
 0x485   : > { %v1553_v13 = vrot.slane %v1549_v52, %v3304_v44  ;;  %v1619_v58 = vadd.f32 %v1618_v1, %v1523_v25  ;;  %v1869_v1 = vld [vmem:[%s2157_s11 + $0x20] sm:$0xff] }
 0x487   : > { %v1555_v51 = vmul.f32 %v1553_v13, %v1525_v47  ;;  %v1554_v45 = vmul.f32 %v1553_v13, %v1524_v43  ;;  %v1620_v38 = vmax.f32 %v1619_v58, 0.0 }
 0x489   : > { %v1559_v39 = vsel %vm1538_vm8, %v1555_v51, 0.0  ;;  %v1556_v40 = vsel %vm1538_vm8, %v1554_v45, 0.0  ;;  %v1624_v14 = vrot.slane %v1620_v38, %v3304_v44 }
 0x48a   : > { %1560 = vadd.xlane.f32.xlu1 %v1559_v39  ;;  %1557 = vadd.xlane.f32.xlu0 %v1556_v40  ;;  %v1871_v40 = vld [vmem:[%s2157_s11 + $0x30] sm:$0xff] }
 0x48b   : > { %v1626_v7 = vmul.f32 %v1624_v14, %v1525_v47  ;;  %v1625_v63 = vmul.f32 %v1624_v14, %v1524_v43  ;;  %v1870_v43 = vld [vmem:[%s2157_s11 + $0x28] sm:$0xff] }
 0x48d   : > { %v1630_v37 = vsel %vm1538_vm8, %v1626_v7, 0.0  ;;  %v1627_v34 = vsel %vm1538_vm8, %v1625_v63, 0.0  ;;  %v1872_v7 = vld [vmem:[%s2157_s11 + $0x38] sm:$0xff] }
 0x48e   : > { %1631 = vadd.xlane.f32.xlu1 %v1630_v37  ;;  %1628 = vadd.xlane.f32.xlu0 %v1627_v34  ;;  %v1874_v37 = vld [vmem:[%s2157_s11 + $0x18] sm:$0xff] }
 0x517   : > { %v1558_v24 = vpop.xlane.xlu0 %1557  ;;  %v1561_v28 = vpop.xlane.xlu1 %1560 }
 0x518   : > { %v1562_v33 = vadd.f32 %v1558_v24, %v1526_v35  ;;  %v1563_v16 = vadd.f32 %v1561_v28, %v1527_v4 }
 0x51a   : > { %v1564_v50 = vsub.f32 0.0, %v1562_v33  ;;  %v1565_v32 = vsub.f32 0.0, %v1563_v16 }
 0x51b   : > { %v1629_v0 = vpop.xlane.xlu0 %1628  ;;  %v1632_v41 = vpop.xlane.xlu1 %1631 }
 0x51c   : > { %v1566_v5 = vmul.f32 1.442695, %v1564_v50  ;;  %v1568_v19 = vmul.f32 1.442695, %v1565_v32  ;;  %v1633_v27 = vadd.f32 %v1629_v0, %v1526_v35  ;;  %v1634_v30 = vadd.f32 %v1632_v41, %v1527_v4 }
 0x51e   : > { %1851 = vpow2.f32 %v1566_v5  ;;  %v1635_v6 = vsub.f32 0.0, %v1633_v27  ;;  %v1636_v62 = vsub.f32 0.0, %v1634_v30 }
 0x51f   : > { %1853 = vpow2.f32 %v1568_v19 }
 0x520   : > { %v1637_v18 = vmul.f32 1.442695, %v1635_v6  ;;  %v1639_v36 = vmul.f32 1.442695, %v1636_v62 }
 0x522   : > { %1855 = vpow2.f32 %v1637_v18 }
 0x523   : > { %1857 = vpow2.f32 %v1639_v36 }
 0x528   : > { %v1852_v8 = vpop.eup %1851 }
 0x529   : > { %v1854_v12 = vpop.eup %1853  ;;  %v1570_v11 = vadd.f32 1.0, %v1852_v8 }
 0x52a   : > { %v1571_v31 = vadd.f32 1.0, %v1854_v12 }
 0x52b   : > { %1859 = vrcp.f32 %v1570_v11 }
 0x52c   : > { %v1856_v17 = vpop.eup %1855  ;;  %1861 = vrcp.f32 %v1571_v31 }
 0x52d   : > { %v1858_v48 = vpop.eup %1857  ;;  %v1641_v56 = vadd.f32 1.0, %v1856_v17 }
 0x52e   : > { %v1642_v57 = vadd.f32 1.0, %v1858_v48 }
 0x52f   : > { %1863 = vrcp.f32 %v1641_v56 }
 0x530   : > { %1865 = vrcp.f32 %v1642_v57 }
 0x535   : > { %v1860_v10 = vpop.eup %1859 }
 0x536   : > { %v1862_v46 = vpop.eup %1861  ;;  %1576 = vperm.xlu0 %1843, %v1860_v10  }
 0x537   : > { %1581 = vperm.xlu1 %1844, %v1862_v46  }
 0x539   : > { %v1864_v20 = vpop.eup %1863 }
 0x53a   : > { %v1866_v49 = vpop.eup %1865 }
 0x53b   : > { %1647 = vperm.xlu1 %1844, %v1864_v20   ;;  %1652 = vperm.xlu0 %1843, %v1866_v49  }
 0x5b5   : > { %v1577_v15 = vpop.permute.xlu0 %1576 }
 0x5b6   : > { %v1584_v54 = vmul.f32 %v1577_v15, %v3037_v3  ;;  %v1585_v59 = vmul.f32 %v1577_v15, %v3039_v9  ;;  %v1582_v53 = vpop.permute.xlu1 %1581 }
 0x5b7   : > { %v1586_v25 = vmul.f32 %v1582_v53, %v3041_v55  ;;  %v1587_v22 = vmul.f32 %v1582_v53, %v3045_v42 }
 0x5b8   : > { %v1588_v21 = vadd.f32 %v1867_v2, %v1584_v54  ;;  %v1589_v52 = vadd.f32 %v1868_v29, %v1585_v59 }
 0x5b9   : > { %v1590_v47 = vadd.f32 %v1869_v1, %v1586_v25  ;;  %v1591_v44 = vadd.f32 %v1870_v43, %v1587_v22 }
 0x5ba   : > { %v1592_v13 = vmax.f32 %v1588_v21, 0.0  ;;  %v1593_v58 = vmax.f32 %v1589_v52, 0.0  ;;  %v1653_v3 = vpop.permute.xlu0 %1652  ;;  %v1648_v9 = vpop.permute.xlu1 %1647 }
 0x5bb   : > { %v1594_v55 = vmax.f32 %v1590_v47, 0.0  ;;  %v1595_v42 = vmax.f32 %v1591_v44, 0.0  ;;  %v1657_v51 = vmul.f32 %v1653_v3, %v3047_v61  ;;  %v1658_v45 = vmul.f32 %v1653_v3, %v3049_v26  ;;  %v1873_v61 = vld [vmem:[%s2157_s11 + $0x10] sm:$0xff]  ;;  %s1986_s11 = smov [#allocation5]  }
 0x5bc   : > { %1596 = vst [vmem:[%s377_s20] sm:$0xff] %v1592_v13  ;;  %1597 = vst [vmem:[%s377_s20 + $0x8] sm:$0xff] %v1593_v58  ;;  %v1655_v38 = vmul.f32 %v1648_v9, %v3051_v23  ;;  %v1656_v39 = vmul.f32 %v1648_v9, %v3053_v60  ;;  %s1909_s22 = sshll.u32 %s1986_s11, 4  ;;  %s1910_s22 = int_to_ptr.vmem [resolvable:$false] %s1909_s22 }
 0x5bd   : > { %1598 = vst [vmem:[%s377_s20 + $0x20] sm:$0xff] %v1594_v55  ;;  %1599 = vst [vmem:[%s377_s20 + $0x28] sm:$0xff] %v1595_v42  ;;  %v1661_v14 = vadd.f32 %v1871_v40, %v1657_v51  ;;  %v1662_v63 = vadd.f32 %v1872_v7, %v1658_v45  ;;  %s1911_s24 = scalar_lea.vmem %s1910_s22, 2048  ;;  %p1912_p4 = scmp.lt.s32.totalorder %s3109_s21, %s1910_s22 }
 0x5be   : > { %v1659_v26 = vadd.f32 %v1873_v61, %v1655_v38  ;;  %v1660_v34 = vadd.f32 %v1874_v37, %v1656_v39  ;;  %p1913_p10 = scmp.lt.s32.totalorder %s1911_s24, %s1905_s28 }
 0x5bf   : > { %v1665_v23 = vmax.f32 %v1661_v14, 0.0  ;;  %v1666_v35 = vmax.f32 %v1662_v63, 0.0 }
 0x5c0   : > { %v1663_v60 = vmax.f32 %v1659_v26, 0.0  ;;  %v1664_v4 = vmax.f32 %v1660_v34, 0.0  ;;  %p1914_p1 = por %p1913_p10, %p1912_p4 }
 0x5c1   : > { %1669 = vst [vmem:[%s377_s20 + $0x30] sm:$0xff] %v1665_v23  ;;  %1670 = vst [vmem:[%s377_s20 + $0x38] sm:$0xff] %v1666_v35 }
 0x5c2   : > { %1667 = vst [vmem:[%s377_s20 + $0x10] sm:$0xff] %v1663_v60  ;;  %1668 = vst [vmem:[%s377_s20 + $0x18] sm:$0xff] %v1664_v4  ;;  %p1915_p3 = pnand %p1914_p1, %p1908_p13 }
 0x5c4   : > { %1918 = shalt.err (!%p1915_p3)
}
 0x5c5   : > { %s1919_s12 = scalar_lea.hbm %s3116_s29, 1024  ;;  %s1923_s18 = scalar_lea.hbm %s3170_s10, 2048 }
 0x5c6   : > { %p1920_p5 = scmp.ne.s32.totalorder %s3116_s29, %s1919_s12  ;;  %p1924_p9 = scmp.lt.u32.totalorder %s3116_s29, %s3170_s10 }
 0x5c7   : > { %p1925_p0 = scmp.lt.u32.totalorder %s1923_s18, %s1919_s12  ;;  %p1927_p6 = scmp.lt.u32.totalorder %s1919_s12, %s3116_s29 }
 0x5c8   : > { %p1921_p7 = pnand %p1920_p5, %p3306_p11 }
 0x5c9   : > { %p1926_p2 = por %p1925_p0, %p1924_p9 }
 0x5ca   : > { %p1922_p8 = pneg %p1921_p7 }
 0x5cb   : > { %p1928_p12 = por %p1927_p6, %p1926_p2 }
 0x5cd   : > { %p1929_p13 = pnand %p1928_p12, %p1922_p8 }
 0x5cf   : > { %1932 = shalt.err (!%p1929_p13)
}
 0x5d0   : > { %s1987_s28 = smov 512   ;;  %s1988_s22 = smov 1024  }
 0x5d1   : > { %s1989_s24 = smov 32  }
 0x5d2   : > { %1784 = dma.vmem_to_hbm [thread:$0]  (%p3306_p11), %s3109_s21, 1024, %s3116_s29, %s1672_s23, %s1987_s28, %s1988_s22, %s1989_s24  }
 0x5d3 PF: > { %s1700_s20 = sand.u32 1, %s1959_s13   ;;  %p3307_p4 = scmp.ne.s32.totalorder %s3226_s26, 0 }
 0x5d4   : > { %p3308_p10 = scmp.ge.s32.totalorder %s1971_s16, 2  ;;  %s1701_s12 = scalar_lea.sflag [#allocation4], %s1700_s20 }
 0x5d6   : > { %p1791_p1 = pnand %p3308_p10, %p3307_p4 }
 0x5d8   : > { %1954 = dma.done.wait (!%p1791_p1), %s1701_s12, 1024  }
 0x5d9   : > { %1956 = vsyncadd (!%p1791_p1), %s1701_s12, 4294966272  ;;  %s3309_s30 = sld [smem:[#allocation8_spill]]  ;;  %p23_p3 = scmp.ge.s32.totalorder %s2070_s19, 4  }
 0x5da   : > { %s3310_s13 = smov %s1963_s14  ;;  %s3311_s14 = smov %s1967_s15 }
 0x5db   : > { %s3313_s16 = smov %s2070_s19  ;;  %25 = sbr.rel (!%p23_p3) target bundleno = 5 (0x5), region = 105 }
 0x5df   : > { %s3312_s15 = smov %s3309_s30 }
 0x5e2   :  { %1706 = vsyncpa [#allocation3], 1 }
 0x5e3   :  { %1708 = vsyncpa [#allocation3 + $0x1], 1 }
 0x5e4   :  { %1709 = vsyncpa [#allocation4], 1 }
 0x5e5   :  { %1711 = vsyncpa [#allocation4 + $0x1], 1 }

</bundles_post_ra>
